<compile_context>
chip_gen: v5e
topology: v5e:2x2
jax: 0.10.0
libtpu: 0.0.40
codegen_flags: <defaults>
</compile_context>

<pallas_src>
import jax
import jax.numpy as jnp
from jax import lax
from jax.experimental import pallas as pl
from jax.experimental.pallas import tpu as pltpu

C_IN = 192
C_OUT = 192
K = 3
STRIDE = 2


def _pick_row_tile(oh: int, ow: int) -> int:
    """Largest divisor of `oh` whose double-buffered blocks fit a VMEM budget."""
    budget = 20 * 1024 * 1024
    best = 1
    for t in range(1, oh + 1):
        if oh % t:
            continue
        xe = (2 * t + 1) * (ow + 1) * C_IN * 2          # bf16 even phase
        xo = (2 * t + 1) * ow * C_IN * 2                # bf16 odd phase
        out = t * ow * 2 * C_OUT * 4                    # f32 fused output
        w = K * K * C_IN * C_OUT * 2                    # bf16 weights
        need = 2 * (xe + xo + out) + 2 * w + (1 << 20)  # double-buffered + slack
        if need <= budget:
            best = t
    return best


def _mixed5a_kernel(xe_ref, xo_ref, w_ref, b_ref, out_ref):
    # xe_ref : (1, 1, 2T+1, OW+1, C_IN)  bf16 even-column phase of row window
    # xo_ref : (1, 1, 2T+1, OW,   C_IN)  bf16 odd-column phase
    # w_ref  : (9, C_IN, C_OUT)          bf16, BN scale folded, (kh, kw) major
    # b_ref  : (1, C_OUT)                f32 folded BN bias
    # out_ref: (1, T, OW, 2*C_OUT)       f32  conv | pool, lane-dense (384)
    T = out_ref.shape[1]
    OW = out_ref.shape[2]
    bias = b_ref[...]                                   # (1, C_OUT) f32

    def row_body(r, carry):
        # One output row per iteration: live set (acc + pooled + tap) stays
        # small, so nothing spills, and the loop boundary bounds live ranges.
        acc = jnp.zeros((OW, C_OUT), jnp.float32)
        pooled = None
        for kh in range(K):
            row = 2 * r + kh
            for kw in range(K):
                if kw == 1:
                    tap = xo_ref[0, 0, row, :, :]                     # (OW, C)
                else:
                    tap = xe_ref[0, 0, row, pl.ds(kw // 2, OW), :]    # (OW, C)
                pooled = tap if pooled is None else jnp.maximum(pooled, tap)
                acc = acc + jnp.dot(tap, w_ref[kh * K + kw],
                                    preferred_element_type=jnp.float32)
        conv = jnp.maximum(acc + bias, 0.0)                  # folded bias+ReLU
        row_out = jnp.concatenate(
            [conv, pooled.astype(jnp.float32)], axis=-1)     # (OW, 384)
        out_ref[0, pl.ds(r, 1)] = row_out[None].astype(out_ref.dtype)
        return carry

    lax.fori_loop(0, T, row_body, None)


def mixed_5a(x_nchw, weight, gamma, beta, running_mean, running_var, eps=1e-3):
    """x_nchw: (N, 192, H, W) float32. Returns (N, 384, OH, OW) float32."""
    N, C, H, W = x_nchw.shape
    assert C == C_IN
    OH = (H - K) // STRIDE + 1
    OW = (W - K) // STRIDE + 1
    T = _pick_row_tile(OH, OW)
    nT = OH // T

    # NHWC + bf16 cast + stride-2 column decimation in one fused pre-pass.
    x = jnp.transpose(x_nchw, (0, 2, 3, 1)).astype(jnp.bfloat16)     # NHWC bf16
    x_even = x[:, :, 0:2 * OW + 1:2, :]                   # (N, H, OW+1, C)
    x_odd = x[:, :, 1:2 * OW:2, :]                        # (N, H, OW,   C)

    # Row windows: tile t covers input rows [2*T*t, 2*T*t + 2T].  With the
    # full-image tile (nT == 1, the common case) this is a plain slice, so
    # there is no extra stack/concat HBM pass.
    def row_windows(a):
        if nT == 1:
            return a[:, None, :2 * T + 1]
        return jnp.stack(
            [a[:, 2 * T * t: 2 * T * t + 2 * T + 1] for t in range(nT)],
            axis=1)

    xe_t = row_windows(x_even)                            # (N, nT, 2T+1, OW+1, C)
    xo_t = row_windows(x_odd)                             # (N, nT, 2T+1, OW,   C)

    # Fold eval-mode BN: scale goes into the weights, bias stays as a vector.
    scale = gamma / jnp.sqrt(running_var + eps)                       # (C_OUT,)
    bias = beta - running_mean * scale                                # (C_OUT,)
    # (Cout, Cin, Kh, Kw) -> (Kh, Kw, Cin, Cout) -> (9, Cin, Cout), bf16.
    w_taps = jnp.transpose(weight * scale[:, None, None, None], (2, 3, 1, 0))
    w_taps = w_taps.reshape(K * K, C_IN, C_OUT).astype(jnp.bfloat16)
    bias2d = bias.reshape(1, C_OUT).astype(jnp.float32)

    out_nhwc = pl.pallas_call(
        _mixed5a_kernel,
        out_shape=jax.ShapeDtypeStruct((N, OH, OW, 2 * C_OUT), jnp.float32),
        grid_spec=pltpu.PrefetchScalarGridSpec(
            num_scalar_prefetch=0,
            grid=(N, nT),
            in_specs=[
                pl.BlockSpec((1, 1, 2 * T + 1, OW + 1, C_IN),
                             lambda n, t: (n, t, 0, 0, 0)),
                pl.BlockSpec((1, 1, 2 * T + 1, OW, C_IN),
                             lambda n, t: (n, t, 0, 0, 0)),
                pl.BlockSpec((K * K, C_IN, C_OUT), lambda n, t: (0, 0, 0)),
                pl.BlockSpec((1, C_OUT), lambda n, t: (0, 0)),
            ],
            out_specs=pl.BlockSpec((1, T, OW, 2 * C_OUT),
                                   lambda n, t: (n, t, 0, 0)),
        ),
        compiler_params=pltpu.CompilerParams(
            dimension_semantics=("parallel", "parallel"),
            vmem_limit_bytes=32 * 1024 * 1024,
        ),
    )(xe_t, xo_t, w_taps, bias2d)

    # conv (0:192) | pool (192:384) already concatenated along channels;
    # single NHWC -> NCHW transpose (== torch.cat((x0, x1), dim=1) in NCHW).
    return jnp.transpose(out_nhwc, (0, 3, 1, 2))


def _reference(x_nchw, weight, gamma, beta, running_mean, running_var, eps=1e-3):
    # Plain-JAX reference for validation (f32 throughout).
    conv = lax.conv_general_dilated(
        x_nchw, weight, window_strides=(STRIDE, STRIDE), padding="VALID",
        dimension_numbers=("NCHW", "OIHW", "NCHW"),
    )
    scale = (gamma / jnp.sqrt(running_var + eps)).reshape(1, C_OUT, 1, 1)
    bias = (beta - running_mean * gamma / jnp.sqrt(running_var + eps)).reshape(
        1, C_OUT, 1, 1
    )
    x0 = jnp.maximum(conv * scale + bias, 0.0)
    x1 = lax.reduce_window(
        x_nchw, -jnp.inf, lax.max,
        window_dimensions=(1, 1, K, K),
        window_strides=(1, 1, STRIDE, STRIDE),
        padding="VALID",
    )
    return jnp.concatenate([x0, x1], axis=1)


if __name__ == "__main__":
    key = jax.random.PRNGKey(0)
    k_x, k_w, k_g, k_b = jax.random.split(key, 4)

    # Small spatial size; channel count is fixed at 192 by the module.
    N, H, W = 2, 9, 9
    x = jax.random.normal(k_x, (N, C_IN, H, W), dtype=jnp.float32)

    weight = jax.random.normal(k_w, (C_OUT, C_IN, K, K), dtype=jnp.float32) * 0.05
    gamma = 1.0 + 0.1 * jax.random.normal(k_g, (C_OUT,), dtype=jnp.float32)
    beta = 0.1 * jax.random.normal(k_b, (C_OUT,), dtype=jnp.float32)
    running_mean = jnp.zeros((C_OUT,), dtype=jnp.float32)
    running_var = jnp.ones((C_OUT,), dtype=jnp.float32)

    out = mixed_5a(x, weight, gamma, beta, running_mean, running_var)
    out = jax.block_until_ready(out)

    ref = _reference(x, weight, gamma, beta, running_mean, running_var)
    OH = (H - K) // STRIDE + 1
    OW = (W - K) // STRIDE + 1
    assert out.shape == (N, 2 * C_OUT, OH, OW)
    # bf16 inputs to MXU + bf16-rounded pool with f32 accumulation -> loose tol.
    assert jnp.allclose(out, ref, atol=3e-2, rtol=3e-2), "mismatch vs reference"

    print("KERNEL_OK")
</pallas_src>

<mosaic_0001>
module attributes {stable_mosaic.version = 11 : i64} {
  func.func @_mixed5a_kernel(%arg0: i32, %arg1: i32, %arg2: memref<1x1x9x5x192xbf16, #tpu.memory_space<vmem>>, %arg3: memref<1x1x9x4x192xbf16, #tpu.memory_space<vmem>>, %arg4: memref<9x192x192xbf16, #tpu.memory_space<vmem>>, %arg5: memref<1x192xf32, #tpu.memory_space<vmem>>, %arg6: memref<1x4x4x384xf32, #tpu.memory_space<vmem>>) attributes {dimension_semantics = [#tpu.dimension_semantics<parallel>, #tpu.dimension_semantics<parallel>], iteration_bounds = array<i64: 2, 1>, scalar_prefetch = 0 : i64, scratch_operands = 0 : i64, tpu.core_type = #tpu.core_type<tc>, window_params = [{transform_indices = @transform_0, window_bounds = array<i64: 1, 1, 9, 5, 192>}, {transform_indices = @transform_1, window_bounds = array<i64: 1, 1, 9, 4, 192>}, {pipeline_mode = #tpu.pipeline_mode<synchronous>, transform_indices = @transform_2, window_bounds = array<i64: 9, 192, 192>}, {pipeline_mode = #tpu.pipeline_mode<synchronous>, transform_indices = @transform_3, window_bounds = array<i64: 1, 192>}, {transform_indices = @transform_4, window_bounds = array<i64: 1, 4, 4, 384>}]} {
    %c0 = arith.constant 0 : index
    %c0_0 = arith.constant 0 : index
    %0 = vector.load %arg5[%c0, %c0_0] : memref<1x192xf32, #tpu.memory_space<vmem>>, vector<1x192xf32>
    %c0_i32 = arith.constant 0 : i32
    %c4_i32 = arith.constant 4 : i32
    %1 = arith.addi %c0_i32, %c4_i32 : i32
    %c1_i32 = arith.constant 1 : i32
    scf.for %arg7 = %c0_i32 to %1 step %c1_i32  : i32 {
      %cst = arith.constant 0.000000e+00 : f32
      %2 = vector.broadcast %cst : f32 to vector<4x192xf32>
      %c2_i32 = arith.constant 2 : i32
      %3 = arith.muli %c2_i32, %arg7 : i32
      %c0_i32_2 = arith.constant 0 : i32
      %4 = arith.addi %3, %c0_i32_2 : i32
      %c0_3 = arith.constant 0 : index
      %c0_4 = arith.constant 0 : index
      %5 = arith.index_cast %4 : i32 to index
      %c0_5 = arith.constant 0 : index
      %c0_6 = arith.constant 0 : index
      %6 = vector.load %arg2[%c0_3, %c0_4, %5, %c0_5, %c0_6] : memref<1x1x9x5x192xbf16, #tpu.memory_space<vmem>>, vector<1x1x1x4x192xbf16>
      %7 = vector.shape_cast %6 : vector<1x1x1x4x192xbf16> to vector<4x192xbf16>
      %c0_7 = arith.constant 0 : index
      %c0_8 = arith.constant 0 : index
      %c0_9 = arith.constant 0 : index
      %8 = vector.load %arg4[%c0_7, %c0_8, %c0_9] : memref<9x192x192xbf16, #tpu.memory_space<vmem>>, vector<1x192x192xbf16>
      %9 = vector.shape_cast %8 : vector<1x192x192xbf16> to vector<192x192xbf16>
      %cst_10 = arith.constant dense<0.000000e+00> : vector<4x192xf32>
      %10 = tpu.matmul %7, %9, %cst_10 {dimension_numbers = #tpu.dot_dimension_numbers<[1], [0], [0], [1], [0, 0, 1, 1], [], []>} : vector<4x192xbf16>, vector<192x192xbf16>, vector<4x192xf32> -> vector<4x192xf32>
      %11 = arith.addf %2, %10 : vector<4x192xf32>
      %c0_11 = arith.constant 0 : index
      %c0_12 = arith.constant 0 : index
      %12 = arith.index_cast %4 : i32 to index
      %c0_13 = arith.constant 0 : index
      %c0_14 = arith.constant 0 : index
      %13 = vector.load %arg3[%c0_11, %c0_12, %12, %c0_13, %c0_14] : memref<1x1x9x4x192xbf16, #tpu.memory_space<vmem>>, vector<1x1x1x4x192xbf16>
      %14 = vector.shape_cast %13 : vector<1x1x1x4x192xbf16> to vector<4x192xbf16>
      %15 = arith.maximumf %7, %14 : vector<4x192xbf16>
      %c1 = arith.constant 1 : index
      %c0_15 = arith.constant 0 : index
      %c0_16 = arith.constant 0 : index
      %16 = vector.load %arg4[%c1, %c0_15, %c0_16] : memref<9x192x192xbf16, #tpu.memory_space<vmem>>, vector<1x192x192xbf16>
      %17 = vector.shape_cast %16 : vector<1x192x192xbf16> to vector<192x192xbf16>
      %cst_17 = arith.constant dense<0.000000e+00> : vector<4x192xf32>
      %18 = tpu.matmul %14, %17, %cst_17 {dimension_numbers = #tpu.dot_dimension_numbers<[1], [0], [0], [1], [0, 0, 1, 1], [], []>} : vector<4x192xbf16>, vector<192x192xbf16>, vector<4x192xf32> -> vector<4x192xf32>
      %19 = arith.addf %11, %18 : vector<4x192xf32>
      %c0_18 = arith.constant 0 : index
      %c0_19 = arith.constant 0 : index
      %20 = arith.index_cast %4 : i32 to index
      %c1_20 = arith.constant 1 : index
      %c0_21 = arith.constant 0 : index
      %21 = vector.load %arg2[%c0_18, %c0_19, %20, %c1_20, %c0_21] : memref<1x1x9x5x192xbf16, #tpu.memory_space<vmem>>, vector<1x1x1x4x192xbf16>
      %22 = vector.shape_cast %21 : vector<1x1x1x4x192xbf16> to vector<4x192xbf16>
      %23 = arith.maximumf %15, %22 : vector<4x192xbf16>
      %c2 = arith.constant 2 : index
      %c0_22 = arith.constant 0 : index
      %c0_23 = arith.constant 0 : index
      %24 = vector.load %arg4[%c2, %c0_22, %c0_23] : memref<9x192x192xbf16, #tpu.memory_space<vmem>>, vector<1x192x192xbf16>
      %25 = vector.shape_cast %24 : vector<1x192x192xbf16> to vector<192x192xbf16>
      %cst_24 = arith.constant dense<0.000000e+00> : vector<4x192xf32>
      %26 = tpu.matmul %22, %25, %cst_24 {dimension_numbers = #tpu.dot_dimension_numbers<[1], [0], [0], [1], [0, 0, 1, 1], [], []>} : vector<4x192xbf16>, vector<192x192xbf16>, vector<4x192xf32> -> vector<4x192xf32>
      %27 = arith.addf %19, %26 : vector<4x192xf32>
      %c2_i32_25 = arith.constant 2 : i32
      %28 = arith.muli %c2_i32_25, %arg7 : i32
      %c1_i32_26 = arith.constant 1 : i32
      %29 = arith.addi %28, %c1_i32_26 : i32
      %c0_27 = arith.constant 0 : index
      %c0_28 = arith.constant 0 : index
      %30 = arith.index_cast %29 : i32 to index
      %c0_29 = arith.constant 0 : index
      %c0_30 = arith.constant 0 : index
      %31 = vector.load %arg2[%c0_27, %c0_28, %30, %c0_29, %c0_30] : memref<1x1x9x5x192xbf16, #tpu.memory_space<vmem>>, vector<1x1x1x4x192xbf16>
      %32 = vector.shape_cast %31 : vector<1x1x1x4x192xbf16> to vector<4x192xbf16>
      %33 = arith.maximumf %23, %32 : vector<4x192xbf16>
      %c3 = arith.constant 3 : index
      %c0_31 = arith.constant 0 : index
      %c0_32 = arith.constant 0 : index
      %34 = vector.load %arg4[%c3, %c0_31, %c0_32] : memref<9x192x192xbf16, #tpu.memory_space<vmem>>, vector<1x192x192xbf16>
      %35 = vector.shape_cast %34 : vector<1x192x192xbf16> to vector<192x192xbf16>
      %cst_33 = arith.constant dense<0.000000e+00> : vector<4x192xf32>
      %36 = tpu.matmul %32, %35, %cst_33 {dimension_numbers = #tpu.dot_dimension_numbers<[1], [0], [0], [1], [0, 0, 1, 1], [], []>} : vector<4x192xbf16>, vector<192x192xbf16>, vector<4x192xf32> -> vector<4x192xf32>
      %37 = arith.addf %27, %36 : vector<4x192xf32>
      %c0_34 = arith.constant 0 : index
      %c0_35 = arith.constant 0 : index
      %38 = arith.index_cast %29 : i32 to index
      %c0_36 = arith.constant 0 : index
      %c0_37 = arith.constant 0 : index
      %39 = vector.load %arg3[%c0_34, %c0_35, %38, %c0_36, %c0_37] : memref<1x1x9x4x192xbf16, #tpu.memory_space<vmem>>, vector<1x1x1x4x192xbf16>
      %40 = vector.shape_cast %39 : vector<1x1x1x4x192xbf16> to vector<4x192xbf16>
      %41 = arith.maximumf %33, %40 : vector<4x192xbf16>
      %c4 = arith.constant 4 : index
      %c0_38 = arith.constant 0 : index
      %c0_39 = arith.constant 0 : index
      %42 = vector.load %arg4[%c4, %c0_38, %c0_39] : memref<9x192x192xbf16, #tpu.memory_space<vmem>>, vector<1x192x192xbf16>
      %43 = vector.shape_cast %42 : vector<1x192x192xbf16> to vector<192x192xbf16>
      %cst_40 = arith.constant dense<0.000000e+00> : vector<4x192xf32>
      %44 = tpu.matmul %40, %43, %cst_40 {dimension_numbers = #tpu.dot_dimension_numbers<[1], [0], [0], [1], [0, 0, 1, 1], [], []>} : vector<4x192xbf16>, vector<192x192xbf16>, vector<4x192xf32> -> vector<4x192xf32>
      %45 = arith.addf %37, %44 : vector<4x192xf32>
      %c0_41 = arith.constant 0 : index
      %c0_42 = arith.constant 0 : index
      %46 = arith.index_cast %29 : i32 to index
      %c1_43 = arith.constant 1 : index
      %c0_44 = arith.constant 0 : index
      %47 = vector.load %arg2[%c0_41, %c0_42, %46, %c1_43, %c0_44] : memref<1x1x9x5x192xbf16, #tpu.memory_space<vmem>>, vector<1x1x1x4x192xbf16>
      %48 = vector.shape_cast %47 : vector<1x1x1x4x192xbf16> to vector<4x192xbf16>
      %49 = arith.maximumf %41, %48 : vector<4x192xbf16>
      %c5 = arith.constant 5 : index
      %c0_45 = arith.constant 0 : index
      %c0_46 = arith.constant 0 : index
      %50 = vector.load %arg4[%c5, %c0_45, %c0_46] : memref<9x192x192xbf16, #tpu.memory_space<vmem>>, vector<1x192x192xbf16>
      %51 = vector.shape_cast %50 : vector<1x192x192xbf16> to vector<192x192xbf16>
      %cst_47 = arith.constant dense<0.000000e+00> : vector<4x192xf32>
      %52 = tpu.matmul %48, %51, %cst_47 {dimension_numbers = #tpu.dot_dimension_numbers<[1], [0], [0], [1], [0, 0, 1, 1], [], []>} : vector<4x192xbf16>, vector<192x192xbf16>, vector<4x192xf32> -> vector<4x192xf32>
      %53 = arith.addf %45, %52 : vector<4x192xf32>
      %c2_i32_48 = arith.constant 2 : i32
      %54 = arith.muli %c2_i32_48, %arg7 : i32
      %c2_i32_49 = arith.constant 2 : i32
      %55 = arith.addi %54, %c2_i32_49 : i32
      %c0_50 = arith.constant 0 : index
      %c0_51 = arith.constant 0 : index
      %56 = arith.index_cast %55 : i32 to index
      %c0_52 = arith.constant 0 : index
      %c0_53 = arith.constant 0 : index
      %57 = vector.load %arg2[%c0_50, %c0_51, %56, %c0_52, %c0_53] : memref<1x1x9x5x192xbf16, #tpu.memory_space<vmem>>, vector<1x1x1x4x192xbf16>
      %58 = vector.shape_cast %57 : vector<1x1x1x4x192xbf16> to vector<4x192xbf16>
      %59 = arith.maximumf %49, %58 : vector<4x192xbf16>
      %c6 = arith.constant 6 : index
      %c0_54 = arith.constant 0 : index
      %c0_55 = arith.constant 0 : index
      %60 = vector.load %arg4[%c6, %c0_54, %c0_55] : memref<9x192x192xbf16, #tpu.memory_space<vmem>>, vector<1x192x192xbf16>
      %61 = vector.shape_cast %60 : vector<1x192x192xbf16> to vector<192x192xbf16>
      %cst_56 = arith.constant dense<0.000000e+00> : vector<4x192xf32>
      %62 = tpu.matmul %58, %61, %cst_56 {dimension_numbers = #tpu.dot_dimension_numbers<[1], [0], [0], [1], [0, 0, 1, 1], [], []>} : vector<4x192xbf16>, vector<192x192xbf16>, vector<4x192xf32> -> vector<4x192xf32>
      %63 = arith.addf %53, %62 : vector<4x192xf32>
      %c0_57 = arith.constant 0 : index
      %c0_58 = arith.constant 0 : index
      %64 = arith.index_cast %55 : i32 to index
      %c0_59 = arith.constant 0 : index
      %c0_60 = arith.constant 0 : index
      %65 = vector.load %arg3[%c0_57, %c0_58, %64, %c0_59, %c0_60] : memref<1x1x9x4x192xbf16, #tpu.memory_space<vmem>>, vector<1x1x1x4x192xbf16>
      %66 = vector.shape_cast %65 : vector<1x1x1x4x192xbf16> to vector<4x192xbf16>
      %67 = arith.maximumf %59, %66 : vector<4x192xbf16>
      %c7 = arith.constant 7 : index
      %c0_61 = arith.constant 0 : index
      %c0_62 = arith.constant 0 : index
      %68 = vector.load %arg4[%c7, %c0_61, %c0_62] : memref<9x192x192xbf16, #tpu.memory_space<vmem>>, vector<1x192x192xbf16>
      %69 = vector.shape_cast %68 : vector<1x192x192xbf16> to vector<192x192xbf16>
      %cst_63 = arith.constant dense<0.000000e+00> : vector<4x192xf32>
      %70 = tpu.matmul %66, %69, %cst_63 {dimension_numbers = #tpu.dot_dimension_numbers<[1], [0], [0], [1], [0, 0, 1, 1], [], []>} : vector<4x192xbf16>, vector<192x192xbf16>, vector<4x192xf32> -> vector<4x192xf32>
      %71 = arith.addf %63, %70 : vector<4x192xf32>
      %c0_64 = arith.constant 0 : index
      %c0_65 = arith.constant 0 : index
      %72 = arith.index_cast %55 : i32 to index
      %c1_66 = arith.constant 1 : index
      %c0_67 = arith.constant 0 : index
      %73 = vector.load %arg2[%c0_64, %c0_65, %72, %c1_66, %c0_67] : memref<1x1x9x5x192xbf16, #tpu.memory_space<vmem>>, vector<1x1x1x4x192xbf16>
      %74 = vector.shape_cast %73 : vector<1x1x1x4x192xbf16> to vector<4x192xbf16>
      %75 = arith.maximumf %67, %74 : vector<4x192xbf16>
      %c8 = arith.constant 8 : index
      %c0_68 = arith.constant 0 : index
      %c0_69 = arith.constant 0 : index
      %76 = vector.load %arg4[%c8, %c0_68, %c0_69] : memref<9x192x192xbf16, #tpu.memory_space<vmem>>, vector<1x192x192xbf16>
      %77 = vector.shape_cast %76 : vector<1x192x192xbf16> to vector<192x192xbf16>
      %cst_70 = arith.constant dense<0.000000e+00> : vector<4x192xf32>
      %78 = tpu.matmul %74, %77, %cst_70 {dimension_numbers = #tpu.dot_dimension_numbers<[1], [0], [0], [1], [0, 0, 1, 1], [], []>} : vector<4x192xbf16>, vector<192x192xbf16>, vector<4x192xf32> -> vector<4x192xf32>
      %79 = arith.addf %71, %78 : vector<4x192xf32>
      %80 = vector.broadcast %0 : vector<1x192xf32> to vector<4x192xf32>
      %81 = arith.addf %79, %80 : vector<4x192xf32>
      %cst_71 = arith.constant 0.000000e+00 : f32
      %82 = vector.broadcast %cst_71 : f32 to vector<4x192xf32>
      %83 = arith.maximumf %81, %82 : vector<4x192xf32>
      %84 = arith.extf %75 : vector<4x192xbf16> to vector<4x192xf32>
      %85 = tpu.concatenate %83, %84 in 1 : vector<4x192xf32>, vector<4x192xf32> -> vector<4x384xf32>
      %86 = vector.shape_cast %85 : vector<4x384xf32> to vector<1x4x384xf32>
      %c0_72 = arith.constant 0 : index
      %87 = arith.index_cast %arg7 : i32 to index
      %c0_73 = arith.constant 0 : index
      %c0_74 = arith.constant 0 : index
      %88 = vector.load %arg6[%c0_72, %87, %c0_73, %c0_74] : memref<1x4x4x384xf32, #tpu.memory_space<vmem>>, vector<1x1x4x384xf32>
      %89 = vector.shape_cast %88 : vector<1x1x4x384xf32> to vector<1x4x384xf32>
      %90 = vector.shape_cast %86 : vector<1x4x384xf32> to vector<1x1x4x384xf32>
      tpu.vector_store %arg6[%c0_72, %87, %c0_73, %c0_74], %90 {strides = array<i32>} : memref<1x4x4x384xf32, #tpu.memory_space<vmem>>, vector<1x1x4x384xf32>,
    }
    %c4_i32_1 = arith.constant 4 : i32
    return
  }
  func.func @transform_0(%arg0: i32, %arg1: i32) -> (i32, i32, i32, i32, i32) {
    %c0_i32 = arith.constant 0 : i32
    %c0_i32_0 = arith.constant 0 : i32
    %c0_i32_1 = arith.constant 0 : i32
    %c0_i32_2 = arith.constant 0 : i32
    return %arg0, %arg1, %c0_i32, %c0_i32_0, %c0_i32_1 : i32, i32, i32, i32, i32
  }
  func.func @transform_1(%arg0: i32, %arg1: i32) -> (i32, i32, i32, i32, i32) {
    %c0_i32 = arith.constant 0 : i32
    %c0_i32_0 = arith.constant 0 : i32
    %c0_i32_1 = arith.constant 0 : i32
    %c0_i32_2 = arith.constant 0 : i32
    return %arg0, %arg1, %c0_i32, %c0_i32_0, %c0_i32_1 : i32, i32, i32, i32, i32
  }
  func.func @transform_2(%arg0: i32, %arg1: i32) -> (i32, i32, i32) {
    %c0_i32 = arith.constant 0 : i32
    %c0_i32_0 = arith.constant 0 : i32
    %c0_i32_1 = arith.constant 0 : i32
    %c0_i32_2 = arith.constant 0 : i32
    return %c0_i32, %c0_i32_0, %c0_i32_1 : i32, i32, i32
  }
  func.func @transform_3(%arg0: i32, %arg1: i32) -> (i32, i32) {
    %c0_i32 = arith.constant 0 : i32
    %c0_i32_0 = arith.constant 0 : i32
    %c0_i32_1 = arith.constant 0 : i32
    return %c0_i32, %c0_i32_0 : i32, i32
  }
  func.func @transform_4(%arg0: i32, %arg1: i32) -> (i32, i32, i32, i32) {
    %c0_i32 = arith.constant 0 : i32
    %c0_i32_0 = arith.constant 0 : i32
    %c0_i32_1 = arith.constant 0 : i32
    return %arg0, %arg1, %c0_i32, %c0_i32_0 : i32, i32, i32, i32
  }
}

</mosaic_0001>

<bundles_post_ra>
// kernel: tpu_custom_call.1
= control target key start
LH: loop header
LB: loop body
LE: loop exit
PB: predicated region body
PF: predicated region fallthrough
CT: control target
= control target key end

     0   :  { %9 = vsyncpa [#allocation3], 0  ;;  %s4186_s0 = inlined_call_operand.vmem [shape: bf16[2,1,9,5,192], index: 0, kind: input, shape index: {}]   ;;  %s4187_s1 = inlined_call_operand.vmem [shape: bf16[2,1,9,4,192], index: 1, kind: input, shape index: {}]   ;;  %s4188_s2 = inlined_call_operand.hbm [shape: bf16[9,192,192], index: 2, kind: input, shape index: {}]   ;;  %s4189_s3 = inlined_call_operand.vmem [shape: f32[1,192], index: 3, kind: input, shape index: {}]   ;;  %s4190_s4 = inlined_call_operand.hbm [shape: f32[2,4,4,384], index: 4, kind: output, shape index: {}]  }
   0x1   :  { %10 = vsyncpa [#allocation4], 0 }
   0x2   :  { %12 = vsyncpa [#allocation4 + $0x1], 0  ;;  %s3873_s15 = smov 0   ;;  %s3875_s16 = smov 0  }
   0x3   :  { %s3877_s17 = smov 0   ;;  %s3879_s18 = smov 0  }
   0x4   :  { %s3881_s19 = smov 0   ;;  %s3883_s20 = smov 0  }
   0x5 LB: > { %s2497_s21 = sadd.s32 4294967295, %s3836_s20   ;;  %s2498_s22 = sadd.s32 4294967294, %s3836_s20   ;;  %s3836_s20 = sphi %s3883_s20, %s18_s20   ;;  %s3832_s19 = sphi %s3881_s19, %s4197_s19   ;;  %s3828_s18 = sphi %s3879_s18, %s4196_s18   ;;  %s3824_s17 = sphi %s3877_s17, %s4195_s17   ;;  %s3820_s16 = sphi %s3875_s16, %s4194_s16   ;;  %s3816_s15 = sphi %s3873_s15, %s4193_s15  }
   0x6   : > { %s30_s23 = sadd.s32 1, %s3832_s19  ;;  %s137_s24 = sadd.s32 1, %s3824_s17 }
   0x7   : > { %p32_p0 = scmp.ge.s32.totalorder %s30_s23, 2  ;;  %p147_p1 = scmp.ne.s32.totalorder %s3824_s17, %s3820_s16 }
   0x8   : > { %p148_p2 = scmp.eq.s32.totalorder %s2497_s21, 1  ;;  %p153_p3 = scmp.ne.s32.totalorder %s3820_s16, %s3816_s15 }
   0x9   : > { %s4199_s23 = smov (%p32_p0, %s30_s23), 0  ;;  %p154_p5 = scmp.eq.s32.totalorder %s2498_s22, 1 }
   0xa   : > { %p3913_p4 = por %p148_p2, %p147_p1  ;;  %s132_s26 = ssub.s32 %s3832_s19, %s4199_s23 }
   0xb   : > { %p2499_p6 = scmp.ge.s32.totalorder %s3836_s20, 1  ;;  %p135_p7 = scmp.eq.s32.totalorder %s132_s26, 0 }
   0xc   : > { %p3920_p8 = por %p154_p5, %p153_p3  ;;  %p161_p9 = scmp.lt.s32.totalorder %s3836_s20, 3 }
   0xd   : > { %s3926_s28 = scalar_select %p135_p7, %s3824_s17, %s137_s24  }
   0xe   : > { %p162_p10 = pnand %p2499_p6, %p161_p9  ;;  %p3652_p11 = scmp.eq.s32.totalorder %s2497_s21, 0 }
   0xf   : > { %s172_s5 = sshll.u32 %s4188_s2, 4  ;;  %s3842_s6 = smov [#allocation2]   ;;  %s173_s5 = int_to_ptr.hbm [resolvable:$true] %s172_s5 }
  0x10   : > { %p3644_p12 = pneg %p162_p10  ;;  %s174_s7 = sshll.u32 %s3842_s6, 4  ;;  %s175_s7 = int_to_ptr.vmem [resolvable:$true] %s174_s7 }
  0x11   : > { %s3843_s8 = smov 128   ;;  %s3844_s9 = smov 8  }
  0x12   : > { %p3645_p13 = pnand %p3652_p11, %p3644_p12  ;;  %217 = sbr.rel (%p162_p10) target bundleno = 407 (0x197), region = 36 }
  0x14   : > { %3647 = dma.hbm_to_vmem [thread:$0]  (!%p3645_p13), %s173_s5, 27648, %s175_s7, [#allocation3], %s3843_s8, %s3843_s8, %s3844_s9  }
  0x17   : > { %3807 = dma.done.wait (%p3652_p11), [#allocation3], 27648  }
  0x18   : > { %3809 = vsyncadd (%p3652_p11), [#allocation3], 4294939648  ;;  %s254_s10 = sand.u32 1, %s3820_s16   ;;  %p257_p0 = scmp.lt.s32.totalorder %s3828_s18, 1  ;;  %v3946_v0 = vld [vmem:[%s4189_s3] sm:$0x3] }
  0x19   : > { %s3935_s11 = smul.u32 48, %s254_s10  ;;  %s3954_s8 = smov 0  }
  0x1a   : > { %s258_s12 = scalar_select %p257_p0, %s3828_s18, 1 }
  0x1b   : > { %s256_s7 = scalar_lea.vmem [#allocation5], %s3935_s11 }
  0x1c   : > { %s3635_s13 = smul.u32 72, %s258_s12 }
  0x1d   : > { %s3636_s14 = smul.u32 36, %s258_s12 }
  0x1e   : > { %s3941_s24 = scalar_lea.vmem %s4186_s0, %s3635_s13 }
  0x1f   : > { %s3951_s6 = scalar_lea.vmem %s4187_s1, %s3636_s14 }
  0x20 LB: >> { %v2568_v1 = vld [vmem:[#allocation2 + $0x130] sm:$0xf]  ;;  %v3452_v2 = vld [vmem:[#allocation2 + $0x134] sm:$0xf0]  ;;  %v3451_v6 = vld [vmem:[#allocation2 + $0x134] sm:$0xf]  ;;  %s3840_s8 = sphi %s3954_s8, %s283_s8  }
  0x21   : >> { %v2600_v3 = vld [vmem:[#allocation2 + $0x170] sm:$0xf]  ;;  %v2569_v4 = vor.u32 %v3452_v2, %v2568_v1  ;;  %v3460_v5 = vld [vmem:[#allocation2 + $0x174] sm:$0xf0]  ;;  %v2570_v7 = vld [vmem:[#allocation2 + $0x138] sm:$0xf0] }
  0x22   : >> { %v2601_v8 = vor.u32 %v3460_v5, %v2600_v3  ;;  %v2573_v9 = vor.u32 %v3451_v6, %v2570_v7  ;;  %v3459_v10 = vld [vmem:[#allocation2 + $0x174] sm:$0xf]  ;;  %v2602_v11 = vld [vmem:[#allocation2 + $0x178] sm:$0xf0]  ;;  %v2560_v12 = vld [vmem:[#allocation2 + $0x120] sm:$0xf] }
  0x23   : >> { %481 = vmatpush.bf16.msra.mxu0 %v2569_v4  ;;  %v2605_v13 = vor.u32 %v3459_v10, %v2602_v11  ;;  %v3450_v14 = vld [vmem:[#allocation2 + $0x124] sm:$0xf0]  ;;  %v2592_v15 = vld [vmem:[#allocation2 + $0x160] sm:$0xf]  ;;  %v3449_v19 = vld [vmem:[#allocation2 + $0x124] sm:$0xf] }
  0x24   : >> { %v3458_v16 = vld [vmem:[#allocation2 + $0x164] sm:$0xf0]  ;;  %498 = vmatpush.bf16.msra.mxu1 %v2601_v8  ;;  %507 = vmatpush.bf16.msra.mxu2 %v2573_v9  ;;  %v2561_v17 = vor.u32 %v3450_v14, %v2560_v12  ;;  %v2562_v20 = vld [vmem:[#allocation2 + $0x128] sm:$0xf0]  ;;  %v3457_v21 = vld [vmem:[#allocation2 + $0x164] sm:$0xf] }
  0x25   : >> { %v2593_v18 = vor.u32 %v3458_v16, %v2592_v15  ;;  %524 = vmatpush.bf16.msra.mxu3 %v2605_v13  ;;  %v2565_v22 = vor.u32 %v3449_v19, %v2562_v20  ;;  %v2594_v23 = vld [vmem:[#allocation2 + $0x168] sm:$0xf0]  ;;  %v2552_v24 = vld [vmem:[#allocation2 + $0x110] sm:$0xf]  ;;  %v3448_v25 = vld [vmem:[#allocation2 + $0x114] sm:$0xf0] }
  0x26   : >> { %v2597_v26 = vor.u32 %v3457_v21, %v2594_v23  ;;  %v2584_v27 = vld [vmem:[#allocation2 + $0x150] sm:$0xf]  ;;  %v3456_v28 = vld [vmem:[#allocation2 + $0x154] sm:$0xf0]  ;;  %v3447_v29 = vld [vmem:[#allocation2 + $0x114] sm:$0xf]  ;;  %v2553_v30 = vor.u32 %v3448_v25, %v2552_v24 }
  0x27   : >> { %482 = vmatpush.bf16.msra.mxu0 %v2561_v17  ;;  %v2554_v31 = vld [vmem:[#allocation2 + $0x118] sm:$0xf0]  ;;  %v3455_v32 = vld [vmem:[#allocation2 + $0x154] sm:$0xf]  ;;  %v2585_v34 = vor.u32 %v3456_v28, %v2584_v27  ;;  %v2544_v36 = vld [vmem:[#allocation2 + $0x100] sm:$0xf] }
  0x28   : >> { %v2586_v33 = vld [vmem:[#allocation2 + $0x158] sm:$0xf0]  ;;  %499 = vmatpush.bf16.msra.mxu1 %v2593_v18  ;;  %508 = vmatpush.bf16.msra.mxu2 %v2565_v22  ;;  %v2557_v35 = vor.u32 %v3447_v29, %v2554_v31  ;;  %v3446_v37 = vld [vmem:[#allocation2 + $0x104] sm:$0xf0]  ;;  %v2576_v38 = vld [vmem:[#allocation2 + $0x140] sm:$0xf] }
  0x29   : >> { %525 = vmatpush.bf16.msra.mxu3 %v2597_v26  ;;  %v2589_v39 = vor.u32 %v3455_v32, %v2586_v33  ;;  %v3454_v40 = vld [vmem:[#allocation2 + $0x144] sm:$0xf0]  ;;  %v3445_v41 = vld [vmem:[#allocation2 + $0x104] sm:$0xf]  ;;  %v2546_v42 = vld [vmem:[#allocation2 + $0x108] sm:$0xf0]  ;;  %v2545_v46 = vor.u32 %v3446_v37, %v2544_v36 }
  0x2a   : >> { %v3453_v43 = vld [vmem:[#allocation2 + $0x144] sm:$0xf]  ;;  %v2578_v44 = vld [vmem:[#allocation2 + $0x148] sm:$0xf0]  ;;  %v2666_v45 = vld [vmem:[#allocation2 + $0x70] sm:$0xf]  ;;  %v2577_v50 = vor.u32 %v3454_v40, %v2576_v38  ;;  %v2549_v51 = vor.u32 %v3445_v41, %v2546_v42 }
  0x2b   : >> { %483 = vmatpush.bf16.msra.mxu0 %v2553_v30  ;;  %v3427_v47 = vld [vmem:[#allocation2 + $0x74] sm:$0xf0]  ;;  %v2698_v48 = vld [vmem:[#allocation2 + $0xb0] sm:$0xf]  ;;  %v2581_v54 = vor.u32 %v3453_v43, %v2578_v44  ;;  %v3443_v56 = vld [vmem:[#allocation2 + $0xf4] sm:$0xf] }
  0x2c   : >> { %v3435_v49 = vld [vmem:[#allocation2 + $0xb4] sm:$0xf0]  ;;  %500 = vmatpush.bf16.msra.mxu1 %v2585_v34  ;;  %509 = vmatpush.bf16.msra.mxu2 %v2557_v35  ;;  %v2536_v52 = vld [vmem:[#allocation2 + $0xf0] sm:$0xf]  ;;  %v2667_v55 = vor.u32 %v3427_v47, %v2666_v45  ;;  %v2538_v57 = vld [vmem:[#allocation2 + $0xf8] sm:$0xf0] }
  0x2d   : >> { %v3444_v53 = vld [vmem:[#allocation2 + $0xf4] sm:$0xf0]  ;;  %526 = vmatpush.bf16.msra.mxu3 %v2589_v39  ;;  %v2699_v58 = vor.u32 %v3435_v49, %v2698_v48  ;;  %v2658_v59 = vld [vmem:[#allocation2 + $0x60] sm:$0xf]  ;;  %v3425_v60 = vld [vmem:[#allocation2 + $0x64] sm:$0xf0]  ;;  %v2541_v1 = vor.u32 %v3443_v56, %v2538_v57 }
  0x2e   : >> { %v2537_v61 = vor.u32 %v3444_v53, %v2536_v52  ;;  %v2690_v62 = vld [vmem:[#allocation2 + $0xa0] sm:$0xf]  ;;  %v3433_v63 = vld [vmem:[#allocation2 + $0xa4] sm:$0xf0]  ;;  %v2659_v4 = vor.u32 %v3425_v60, %v2658_v59  ;;  %v3441_v5 = vld [vmem:[#allocation2 + $0xe4] sm:$0xf] }
  0x2f   : >> { %484 = vmatpush.bf16.msra.mxu0 %v2545_v46  ;;  %v2528_v2 = vld [vmem:[#allocation2 + $0xe0] sm:$0xf]  ;;  %v3442_v3 = vld [vmem:[#allocation2 + $0xe4] sm:$0xf0]  ;;  %v2530_v6 = vld [vmem:[#allocation2 + $0xe8] sm:$0xf0]  ;;  %v2691_v7 = vor.u32 %v3433_v63, %v2690_v62 }
  0x30   : >> { %501 = vmatpush.bf16.msra.mxu1 %v2577_v50  ;;  %510 = vmatpush.bf16.msra.mxu2 %v2549_v51  ;;  %v2650_v8 = vld [vmem:[#allocation2 + $0x50] sm:$0xf]  ;;  %v3423_v9 = vld [vmem:[#allocation2 + $0x54] sm:$0xf0]  ;;  %s3436_s9 = sshll.u32 %s3840_s8, 3  ;;  %v2529_v10 = vor.u32 %v3442_v3, %v2528_v2  ;;  %v2533_v13 = vor.u32 %v3441_v5, %v2530_v6  ;;  %vm478_vm0 = vcmask 523264  }
  0x31   : >> { %527 = vmatpush.bf16.msra.mxu3 %v2581_v54  ;;  %v2682_v11 = vld [vmem:[#allocation2 + $0x90] sm:$0xf]  ;;  %v3431_v12 = vld [vmem:[#allocation2 + $0x94] sm:$0xf0]  ;;  %s3961_s12 = scalar_lea.vmem %s3951_s6, %s3436_s9  ;;  %v2651_v17 = vor.u32 %v3423_v9, %v2650_v8  ;;  %v3439_v18 = vld [vmem:[#allocation2 + $0xd4] sm:$0xf] }
  0x32   : >> { %v2520_v14 = vld [vmem:[#allocation2 + $0xd0] sm:$0xf]  ;;  %v3440_v15 = vld [vmem:[#allocation2 + $0xd4] sm:$0xf0]  ;;  %v2522_v19 = vld [vmem:[#allocation2 + $0xd8] sm:$0xf0]  ;;  %v2683_v21 = vor.u32 %v3431_v12, %v2682_v11 }
  0x33   : >> { %485 = vmatpush.bf16.msra.mxu0 %v2537_v61  ;;  %v315_v16 = vld [vmem:[%s3961_s12] sm:$0xf]  ;;  %v2642_v22 = vld [vmem:[#allocation2 + $0x40] sm:$0xf]  ;;  %v3421_v23 = vld [vmem:[#allocation2 + $0x44] sm:$0xf0]  ;;  %v2521_v25 = vor.u32 %v3440_v15, %v2520_v14  ;;  %v2525_v28 = vor.u32 %v3439_v18, %v2522_v19 }
  0x34   : >> { %662 = vmatpush.bf16.msrb.mxu1 %v2667_v55  ;;  %511 = vmatpush.bf16.msra.mxu2 %v2541_v1  ;;  %v318_v20 = vunpack.c.l.bf16 %v315_v16  ;;  %v2674_v24 = vld [vmem:[#allocation2 + $0x80] sm:$0xf]  ;;  %v3429_v26 = vld [vmem:[#allocation2 + $0x84] sm:$0xf0]  ;;  %v3437_v30 = vld [vmem:[#allocation2 + $0xc4] sm:$0xf]  ;;  %v2643_v32 = vor.u32 %v3421_v23, %v2642_v22 }
  0x35   : >> { %679 = vmatpush.bf16.msrb.mxu3 %v2699_v58  ;;  %v2512_v27 = vld [vmem:[#allocation2 + $0xc0] sm:$0xf]  ;;  %v3438_v29 = vld [vmem:[#allocation2 + $0xc4] sm:$0xf0]  ;;  %v2514_v31 = vld [vmem:[#allocation2 + $0xc8] sm:$0xf0]  ;;  %v2675_v36 = vor.u32 %v3429_v26, %v2674_v24 }
  0x36   : >> { %320 = vst [vmem:[#allocation1] ss:$2 sm:$0xff] %v318_v20  ;;  %v2634_v33 = vld [vmem:[#allocation2 + $0x30] sm:$0xf]  ;;  %v3426_v34 = vld [vmem:[#allocation2 + $0x74] sm:$0xf]  ;;  %v2513_v40 = vor.u32 %v3438_v29, %v2512_v27  ;;  %v2517_v41 = vor.u32 %v3437_v30, %v2514_v31 }
  0x37   : >> { %486 = vmatpush.bf16.msra.mxu0 %v2529_v10  ;;  %v2668_v35 = vld [vmem:[#allocation2 + $0x78] sm:$0xf0]  ;;  %v3419_v37 = vld [vmem:[#allocation2 + $0x34] sm:$0xf0]  ;;  %v3434_v38 = vld [vmem:[#allocation2 + $0xb4] sm:$0xf] }
  0x38   : >> { %663 = vmatpush.bf16.msrb.mxu1 %v2659_v4  ;;  %512 = vmatpush.bf16.msra.mxu2 %v2533_v13  ;;  %v2700_v39 = vld [vmem:[#allocation2 + $0xb8] sm:$0xf0]  ;;  %v2671_v42 = vor.u32 %v3426_v34, %v2668_v35  ;;  %v2626_v43 = vld [vmem:[#allocation2 + $0x20] sm:$0xf]  ;;  %v3417_v44 = vld [vmem:[#allocation2 + $0x24] sm:$0xf0]  ;;  %v2635_v46 = vor.u32 %v3419_v37, %v2634_v33 }
  0x39   : >> { %680 = vmatpush.bf16.msrb.mxu3 %v2691_v7  ;;  %v3424_v45 = vld [vmem:[#allocation2 + $0x64] sm:$0xf]  ;;  %v2703_v47 = vor.u32 %v3434_v38, %v2700_v39  ;;  %v2660_v48 = vld [vmem:[#allocation2 + $0x68] sm:$0xf0]  ;;  %v3969_v54 = vld [vmem:[%s3961_s12 + $0x4] sm:$0xf]  ;;  %v2627_v57 = vor.u32 %v3417_v44, %v2626_v43 }
  0x3a   : >> { %v3432_v49 = vld [vmem:[#allocation2 + $0xa4] sm:$0xf]  ;;  %v2692_v50 = vld [vmem:[#allocation2 + $0xa8] sm:$0xf0]  ;;  %v2663_v53 = vor.u32 %v3424_v45, %v2660_v48  ;;  %v2764_v55 = vld [vmem:[#allocation2 + $0x1f0] sm:$0xf]  ;;  %v1175_v2 = vunpack.c.l.bf16 %v3969_v54 }
  0x3b   : >> { %487 = vmatpush.bf16.msra.mxu0 %v2521_v25  ;;  %v3476_v56 = vld [vmem:[#allocation2 + $0x1f4] sm:$0xf0]  ;;  %v2695_v58 = vor.u32 %v3432_v49, %v2692_v50  ;;  %v2618_v59 = vld [vmem:[#allocation2 + $0x10] sm:$0xf]  ;;  %v3422_v61 = vld [vmem:[#allocation2 + $0x54] sm:$0xf] }
  0x3c   : >> { %664 = vmatpush.bf16.msrb.mxu1 %v2651_v17  ;;  %513 = vmatpush.bf16.msra.mxu2 %v2525_v28  ;;  %v3415_v60 = vld [vmem:[#allocation2 + $0x14] sm:$0xf0]  ;;  %v2652_v62 = vld [vmem:[#allocation2 + $0x58] sm:$0xf0]  ;;  %v2756_v63 = vld [vmem:[#allocation2 + $0x1e0] sm:$0xf]  ;;  %v2765_v5 = vor.u32 %v3476_v56, %v2764_v55 }
  0x3d   : >> { %681 = vmatpush.bf16.msrb.mxu3 %v2683_v21  ;;  %v3964_v51 = vld.sshfl [vmem:[#allocation1] sm:$0xff pattern:$0x75316420]  ;;  %v3966_v52 = vld.sshfl [vmem:[#allocation1 + $0x8] sm:$0xff pattern:$0x75316420]  ;;  %v2619_v9 = vor.u32 %v3415_v60, %v2618_v59  ;;  %v2655_v10 = vor.u32 %v3422_v61, %v2652_v62 }
  0x3e   : >> { %354 = vst [vmem:[#allocation1] ss:$4 sm:$0xff] %v315_v16  ;;  %v3474_v1 = vld [vmem:[#allocation2 + $0x1e4] sm:$0xf0]  ;;  %v3430_v3 = vld [vmem:[#allocation2 + $0x94] sm:$0xf] }
  0x3f   : >> { %488 = vmatpush.bf16.msra.mxu0 %v2513_v40  ;;  %v2684_v4 = vld [vmem:[#allocation2 + $0x98] sm:$0xf0]  ;;  %v2610_v6 = vld [vmem:[#allocation2] sm:$0xf]  ;;  %v3413_v7 = vld [vmem:[#allocation2 + $0x4] sm:$0xf0]  ;;  %v2757_v19 = vor.u32 %v3474_v1, %v2756_v63 }
  0x40   : >> { %665 = vmatpush.bf16.msrb.mxu1 %v2643_v32  ;;  %514 = vmatpush.bf16.msra.mxu2 %v2517_v41  ;;  %s3411_s13 = sshll.u32 %s3840_s8, 4  ;;  %v3420_v8 = vld [vmem:[#allocation2 + $0x44] sm:$0xf]  ;;  %v2644_v11 = vld [vmem:[#allocation2 + $0x48] sm:$0xf0]  ;;  %v2687_v16 = vor.u32 %v3430_v3, %v2684_v4  ;;  %v2611_v24 = vor.u32 %v3413_v7, %v2610_v6  ;;  %s3845_s21 = smov 64  }
  0x41   : >> { %682 = vmatpush.bf16.msrb.mxu3 %v2675_v36  ;;  %v3428_v12 = vld [vmem:[#allocation2 + $0x84] sm:$0xf]  ;;  %v2676_v13 = vld [vmem:[#allocation2 + $0x88] sm:$0xf0]  ;;  %v2796_v17 = vld [vmem:[#allocation2 + $0x230] sm:$0xf]  ;;  %s3976_s14 = scalar_lea.vmem %s3941_s24, %s3411_s13  ;;  %v2647_v25 = vor.u32 %v3420_v8, %v2644_v11 }
  0x42   : >> { %v3484_v18 = vld [vmem:[#allocation2 + $0x234] sm:$0xf0]  ;;  %v3475_v20 = vld [vmem:[#allocation2 + $0x1f4] sm:$0xf]  ;;  %v2766_v21 = vld [vmem:[#allocation2 + $0x1f8] sm:$0xf0]  ;;  %v2679_v26 = vor.u32 %v3428_v12, %v2676_v13 }
  0x43   : >> { %688 = vmatpush.bf16.msrb.mxu0 %v2671_v42  ;;  %v2748_v22 = vld [vmem:[#allocation2 + $0x1d0] sm:$0xf]  ;;  %v3472_v23 = vld [vmem:[#allocation2 + $0x1d4] sm:$0xf0]  ;;  %v2797_v27 = vor.u32 %v3484_v18, %v2796_v17  ;;  %v3418_v28 = vld [vmem:[#allocation2 + $0x34] sm:$0xf]  ;;  %v2769_v31 = vor.u32 %v3475_v20, %v2766_v21 }
  0x44   : >> { %666 = vmatpush.bf16.msrb.mxu1 %v2635_v46  ;;  %705 = vmatpush.bf16.msrb.mxu2 %v2703_v47  ;;  %v2636_v29 = vld [vmem:[#allocation2 + $0x38] sm:$0xf0]  ;;  %v2740_v30 = vld [vmem:[#allocation2 + $0x1c0] sm:$0xf]  ;;  %v3482_v33 = vld [vmem:[#allocation2 + $0x224] sm:$0xf0]  ;;  %v2749_v34 = vor.u32 %v3472_v23, %v2748_v22 }
  0x45   : >> { %v356_v14 = vld.sshfl [vmem:[#allocation1 + $0x8] sm:$0xff pattern:$0x73625140]  ;;  %v355_v15 = vld.sshfl [vmem:[#allocation1] sm:$0xff pattern:$0x73625140]  ;;  %v2639_v39 = vor.u32 %v3418_v28, %v2636_v29 }
  0x46   : >> { %2607 = vmatmul.msk.bf16.vlgmr.msra.gmra.mxu3 %vm478_vm0, %v356_v14  ;;  %2606 = vmatmul.msk.bf16.vlgmr.msra.gmra.mxu1 %vm478_vm0, %v356_v14  ;;  %1177 = vst [vmem:[#allocation1] ss:$2 sm:$0xff] %v1175_v2  ;;  %v2788_v32 = vld [vmem:[#allocation2 + $0x220] sm:$0xf]  ;;  %v288_v35 = vld [vmem:[%s3976_s14] sm:$0x33] }
  0x47   : >> { %689 = vmatpush.bf16.msrb.mxu0 %v2663_v53  ;;  %896 = vmatpush.bf16.msra.mxu3 %v2765_v5  ;;  %v3473_v36 = vld [vmem:[#allocation2 + $0x1e4] sm:$0xf]  ;;  %v2758_v37 = vld [vmem:[#allocation2 + $0x1e8] sm:$0xf0]  ;;  %v3470_v38 = vld [vmem:[#allocation2 + $0x1c4] sm:$0xf0]  ;;  %v2789_v44 = vor.u32 %v3482_v33, %v2788_v32  ;;  %v535_v45 = vunpack.c.h.b16 %v288_v35  ;;  %v534_v47 = vunpack.c.l.b16 %v288_v35 }
  0x48   : >> { %667 = vmatpush.bf16.msrb.mxu1 %v2627_v57  ;;  %706 = vmatpush.bf16.msrb.mxu2 %v2695_v58  ;;  %v3416_v40 = vld [vmem:[#allocation2 + $0x24] sm:$0xf]  ;;  %v2628_v41 = vld [vmem:[#allocation2 + $0x28] sm:$0xf0]  ;;  %v2761_v46 = vor.u32 %v3473_v36, %v2758_v37  ;;  %v2780_v48 = vld [vmem:[#allocation2 + $0x210] sm:$0xf]  ;;  %v2741_v50 = vor.u32 %v3470_v38, %v2740_v30 }
  0x49   : >> { %515 = vmatmul.bf16.vlgmr.msra.gmra.mxu2 %v355_v15  ;;  %489 = vmatmul.bf16.vlgmr.msra.gmra.mxu0 %v355_v15  ;;  %v3480_v49 = vld [vmem:[#allocation2 + $0x214] sm:$0xf0]  ;;  %v2732_v53 = vld [vmem:[#allocation2 + $0x1b0] sm:$0xf]  ;;  %v2631_v56 = vor.u32 %v3416_v40, %v2628_v41  ;;  %v3471_v57 = vld [vmem:[#allocation2 + $0x1d4] sm:$0xf]  ;;  %v537_v62 = vpack.c.b16 %v535_v45, %v535_v45  ;;  %v3985_v63 = vpack.c.b16 %v534_v47, %v534_v47 }
  0x4a   : >> { %v3468_v55 = vld [vmem:[#allocation2 + $0x1b4] sm:$0xf0]  ;;  %v2750_v58 = vld [vmem:[#allocation2 + $0x1d8] sm:$0xf0]  ;;  %v2781_v59 = vor.u32 %v3480_v49, %v2780_v48  ;;  %v3414_v60 = vld [vmem:[#allocation2 + $0x14] sm:$0xf] }
  0x4b   : >> { %690 = vmatpush.bf16.msrb.mxu0 %v2655_v10  ;;  %897 = vmatpush.bf16.msra.mxu3 %v2757_v19  ;;  %v2620_v61 = vld [vmem:[#allocation2 + $0x18] sm:$0xf0]  ;;  %v2772_v1 = vld [vmem:[#allocation2 + $0x200] sm:$0xf]  ;;  %v3478_v2 = vld [vmem:[#allocation2 + $0x204] sm:$0xf0]  ;;  %v2733_v5 = vor.u32 %v3468_v55, %v2732_v53  ;;  %v2753_v7 = vor.u32 %v3471_v57, %v2750_v58 }
  0x4c   : >> { %668 = vmatpush.bf16.msrb.mxu1 %v2619_v9  ;;  %707 = vmatpush.bf16.msrb.mxu2 %v2687_v16  ;;  %v2724_v6 = vld [vmem:[#allocation2 + $0x1a0] sm:$0xf]  ;;  %v2865_v8 = vld [vmem:[#allocation2 + $0x2b0] sm:$0xf]  ;;  %v3501_v9 = vld [vmem:[#allocation2 + $0x2b4] sm:$0xf0]  ;;  %v2623_v11 = vor.u32 %v3414_v60, %v2620_v61  ;;  %v2773_v14 = vor.u32 %v3478_v2, %v2772_v1 }
  0x4d   : >> { %v3979_v42 = vld.sshfl [vmem:[#allocation1] sm:$0xff pattern:$0x75316420]  ;;  %v3981_v43 = vld.sshfl [vmem:[#allocation1 + $0x8] sm:$0xff pattern:$0x75316420]  ;;  %v2866_v17 = vor.u32 %v3501_v9, %v2865_v8 }
  0x4e   : >> { %1211 = vst [vmem:[#allocation1] ss:$4 sm:$0xff] %v3969_v54  ;;  %v714_v54 = vld [vmem:[%s3976_s14] sm:$0x77]  ;;  %v3466_v10 = vld [vmem:[#allocation2 + $0x1a4] sm:$0xf0] }
  0x4f   : >> { %691 = vmatpush.bf16.msrb.mxu0 %v2647_v25  ;;  %898 = vmatpush.bf16.msra.mxu3 %v2749_v34  ;;  %v754_v3 = vunpack.c.l.b16 %v714_v54  ;;  %v755_v4 = vunpack.c.h.b16 %v714_v54  ;;  %v3469_v12 = vld [vmem:[#allocation2 + $0x1c4] sm:$0xf]  ;;  %v2742_v13 = vld [vmem:[#allocation2 + $0x1c8] sm:$0xf0]  ;;  %v3483_v19 = vld [vmem:[#allocation2 + $0x234] sm:$0xf]  ;;  %v2725_v22 = vor.u32 %v3466_v10, %v2724_v6 }
  0x50   : >> { %669 = vmatpush.bf16.msrb.mxu1 %v2611_v24  ;;  %708 = vmatpush.bf16.msrb.mxu2 %v2679_v26  ;;  %v3412_v15 = vld [vmem:[#allocation2 + $0x4] sm:$0xf]  ;;  %v2612_v16 = vld [vmem:[#allocation2 + $0x8] sm:$0xf0]  ;;  %v2798_v20 = vld [vmem:[#allocation2 + $0x238] sm:$0xf0]  ;;  %v2745_v24 = vor.u32 %v3469_v12, %v2742_v13 }
  0x51   : >> { %v3989_v18 = vpack.c.b16 %v754_v3, %v754_v3  ;;  %v757_v21 = vpack.c.b16 %v755_v4, %v755_v4  ;;  %v2716_v23 = vld [vmem:[#allocation2 + $0x190] sm:$0xf]  ;;  %v2857_v25 = vld [vmem:[#allocation2 + $0x2a0] sm:$0xf]  ;;  %v3499_v26 = vld [vmem:[#allocation2 + $0x2a4] sm:$0xf0]  ;;  %v2615_v28 = vor.u32 %v3412_v15, %v2612_v16 }
  0x52   : >> { %v3467_v29 = vld [vmem:[#allocation2 + $0x1b4] sm:$0xf]  ;;  %v2734_v30 = vld [vmem:[#allocation2 + $0x1b8] sm:$0xf0]  ;;  %v2858_v33 = vor.u32 %v3499_v26, %v2857_v25  ;;  %v3481_v34 = vld [vmem:[#allocation2 + $0x224] sm:$0xf] }
  0x53   : >> { %692 = vmatpush.bf16.msrb.mxu0 %v2639_v39  ;;  %899 = vmatpush.bf16.msra.mxu3 %v2741_v50  ;;  %v761_v32 = vshll.u32 %v3989_v18, 16  ;;  %v2790_v35 = vld [vmem:[#allocation2 + $0x228] sm:$0xf0]  ;;  %v768_v36 = vshll.u32 %v757_v21, 16  ;;  %v2708_v38 = vld [vmem:[#allocation2 + $0x180] sm:$0xf]  ;;  %v2737_v39 = vor.u32 %v3467_v29, %v2734_v30 }
  0x54   : >> { %913 = vmatpush.bf16.msra.mxu1 %v2797_v27  ;;  %922 = vmatpush.bf16.msra.mxu2 %v2769_v31  ;;  %v3464_v27 = vld [vmem:[#allocation2 + $0x194] sm:$0xf0]  ;;  %v2801_v31 = vor.u32 %v3483_v19, %v2798_v20  ;;  %v2849_v40 = vld [vmem:[#allocation2 + $0x290] sm:$0xf]  ;;  %v3465_v45 = vld [vmem:[#allocation2 + $0x1a4] sm:$0xf]  ;;  %v2793_v50 = vor.u32 %v3481_v34, %v2790_v35 }
  0x55   : >> { %v2717_v37 = vor.u32 %v3464_v27, %v2716_v23  ;;  %v3497_v41 = vld [vmem:[#allocation2 + $0x294] sm:$0xf0]  ;;  %v2897_v47 = vld [vmem:[#allocation2 + $0x2f0] sm:$0xf]  ;;  %v759_v49 = vshrl.u32 %v3989_v18, 16  ;;  %v766_v53 = vshrl.u32 %v757_v21, 16 }
  0x56   : >> { %2704 = vmatmul.msk.bf16.vlgmr.msrb.gmra.mxu3 %vm478_vm0, %v537_v62  ;;  %670 = vmatmul.bf16.vlgmr.msrb.gmra.mxu1 %v3985_v63  ;;  %v3509_v48 = vld [vmem:[#allocation2 + $0x2f4] sm:$0xf0]  ;;  %v763_v55 = vrot.slane %v761_v32, 1  ;;  %v2850_v57 = vor.u32 %v3497_v41, %v2849_v40  ;;  %v3479_v58 = vld [vmem:[#allocation2 + $0x214] sm:$0xf]  ;;  %s3633_s22 = smul.u32 12, %s3840_s8 }
  0x57   : >> { %693 = vmatpush.bf16.msrb.mxu0 %v2631_v56  ;;  %900 = vmatpush.bf16.msra.mxu3 %v2733_v5  ;;  %v770_v56 = vrot.slane %v768_v36, 1  ;;  %v3463_v54 = vld [vmem:[#allocation2 + $0x194] sm:$0xf]  ;;  %v2718_v1 = vld [vmem:[#allocation2 + $0x198] sm:$0xf0]  ;;  %vm2328_vm1 = vcmask 1043456  }
  0x58   : >> { %914 = vmatpush.bf16.msra.mxu1 %v2789_v44  ;;  %923 = vmatpush.bf16.msra.mxu2 %v2761_v46  ;;  %v3462_v44 = vld [vmem:[#allocation2 + $0x184] sm:$0xf0]  ;;  %v2726_v46 = vld [vmem:[#allocation2 + $0x1a8] sm:$0xf0]  ;;  %v2841_v2 = vld [vmem:[#allocation2 + $0x280] sm:$0xf]  ;;  %v2721_v12 = vor.u32 %v3463_v54, %v2718_v1  ;;  %s4135_s26 = scalar_lea.vmem %s256_s7, %s3633_s22 [#allocation5] }
  0x59   : >> { %2705 = vmatmul.msk.bf16.vlgmr.msrb.gmra.mxu2 %vm478_vm0, %v537_v62  ;;  %v2709_v60 = vor.u32 %v3462_v44, %v2708_v38  ;;  %v2729_v61 = vor.u32 %v3465_v45, %v2726_v46  ;;  %v2898_v62 = vor.u32 %v3509_v48, %v2897_v47  ;;  %v3495_v3 = vld [vmem:[#allocation2 + $0x284] sm:$0xf0]  ;;  %v2889_v4 = vld [vmem:[#allocation2 + $0x2e0] sm:$0xf]  ;;  %v3995_v8 = vor.u32 %v770_v56, %v766_v53  ;;  %v3477_v9 = vld [vmem:[#allocation2 + $0x204] sm:$0xf] }
  0x5a   : >> { %v3507_v5 = vld [vmem:[#allocation2 + $0x2e4] sm:$0xf0]  ;;  %v2774_v10 = vld [vmem:[#allocation2 + $0x208] sm:$0xf0]  ;;  %v2842_v13 = vor.u32 %v3495_v3, %v2841_v2  ;;  %v2867_v15 = vld [vmem:[#allocation2 + $0x2b8] sm:$0xf0] }
  0x5b   : >> { %694 = vmatpush.bf16.msrb.mxu0 %v2623_v11  ;;  %901 = vmatpush.bf16.msra.mxu3 %v2725_v22  ;;  %v2881_v11 = vld [vmem:[#allocation2 + $0x2d0] sm:$0xf]  ;;  %v2890_v16 = vor.u32 %v3507_v5, %v2889_v4  ;;  %v3493_v19 = vld [vmem:[#allocation2 + $0x274] sm:$0xf0]  ;;  %v2777_v21 = vor.u32 %v3477_v9, %v2774_v10  ;;  %v3508_v22 = vld [vmem:[#allocation2 + $0x2f4] sm:$0xf] }
  0x5c   : >> { %915 = vmatpush.bf16.msra.mxu1 %v2781_v59  ;;  %924 = vmatpush.bf16.msra.mxu2 %v2753_v7  ;;  %v2782_v59 = vld [vmem:[#allocation2 + $0x218] sm:$0xf0]  ;;  %v764_v7 = vor.u32 %v763_v55, %v759_v49  ;;  %v2833_v18 = vld [vmem:[#allocation2 + $0x270] sm:$0xf]  ;;  %v3505_v20 = vld [vmem:[#allocation2 + $0x2d4] sm:$0xf0] }
  0x5d   : >> { %v2785_v6 = vor.u32 %v3479_v58, %v2782_v59  ;;  %v2899_v23 = vld [vmem:[#allocation2 + $0x2f8] sm:$0xf0]  ;;  %v2834_v26 = vor.u32 %v3493_v19, %v2833_v18  ;;  %v3498_v27 = vld [vmem:[#allocation2 + $0x2a4] sm:$0xf]  ;;  %v2882_v29 = vor.u32 %v3505_v20, %v2881_v11  ;;  %v2873_v30 = vld [vmem:[#allocation2 + $0x2c0] sm:$0xf] }
  0x5e   : >> { %v2825_v32 = vld [vmem:[#allocation2 + $0x260] sm:$0xf]  ;;  %v3503_v34 = vld [vmem:[#allocation2 + $0x2c4] sm:$0xf0]  ;;  %v3506_v35 = vld [vmem:[#allocation2 + $0x2e4] sm:$0xf] }
  0x5f   : >> { %695 = vmatpush.bf16.msrb.mxu0 %v2615_v28  ;;  %902 = vmatpush.bf16.msra.mxu3 %v2717_v37  ;;  %v2859_v28 = vld [vmem:[#allocation2 + $0x2a8] sm:$0xf0]  ;;  %v2966_v37 = vld [vmem:[#allocation2 + $0x370] sm:$0xf]  ;;  %v3526_v38 = vld [vmem:[#allocation2 + $0x374] sm:$0xf0]  ;;  %v2874_v46 = vor.u32 %v3503_v34, %v2873_v30 }
  0x60   : >> { %916 = vmatpush.bf16.msra.mxu1 %v2773_v14  ;;  %925 = vmatpush.bf16.msra.mxu2 %v2745_v24  ;;  %v3461_v14 = vld [vmem:[#allocation2 + $0x184] sm:$0xf]  ;;  %v2891_v36 = vld [vmem:[#allocation2 + $0x2e8] sm:$0xf0]  ;;  %v3496_v41 = vld [vmem:[#allocation2 + $0x294] sm:$0xf] }
  0x61   : >> { %v2851_v44 = vld [vmem:[#allocation2 + $0x298] sm:$0xf0]  ;;  %v2806_v45 = vld [vmem:[%s3976_s14 + $0x8] sm:$0x33]  ;;  %v2894_v47 = vor.u32 %v3506_v35, %v2891_v36  ;;  %v2817_v48 = vld [vmem:[#allocation2 + $0x250] sm:$0xf] }
  0x62   : >> { %696 = vmatmul.bf16.vlgmr.msrb.gmra.mxu0 %v3985_v63  ;;  %v3500_v63 = vld [vmem:[#allocation2 + $0x2b4] sm:$0xf]  ;;  %v3489_v49 = vld [vmem:[#allocation2 + $0x254] sm:$0xf0]  ;;  %v2883_v55 = vld [vmem:[#allocation2 + $0x2d8] sm:$0xf0]  ;;  %v2854_v58 = vor.u32 %v3496_v41, %v2851_v44  ;;  %v989_v59 = vunpack.c.h.b16 %v2806_v45 }
  0x63   : >> { %939 = vmatpush.bf16.msra.mxu0 %v2801_v31  ;;  %903 = vmatpush.bf16.msra.mxu3 %v2709_v60  ;;  %v2870_v24 = vor.u32 %v3500_v63, %v2867_v15  ;;  %v2902_v31 = vor.u32 %v3508_v22, %v2899_v23  ;;  %v3504_v53 = vld [vmem:[#allocation2 + $0x2d4] sm:$0xf]  ;;  %v2958_v56 = vld [vmem:[#allocation2 + $0x360] sm:$0xf]  ;;  %v2818_v60 = vor.u32 %v3489_v49, %v2817_v48  ;;  %v2843_v54 = vld [vmem:[#allocation2 + $0x288] sm:$0xf0]  ;;  %v988_v15 = vunpack.c.l.b16 %v2806_v45 }
  0x64   : >> { %1116 = vmatpush.bf16.msrb.mxu1 %v2866_v17  ;;  %926 = vmatpush.bf16.msra.mxu2 %v2737_v39  ;;  %v2710_v17 = vld [vmem:[#allocation2 + $0x188] sm:$0xf0]  ;;  %v2862_v39 = vor.u32 %v3498_v27, %v2859_v28  ;;  %v2950_v1 = vld [vmem:[#allocation2 + $0x350] sm:$0xf]  ;;  %v2886_v2 = vor.u32 %v3504_v53, %v2883_v55  ;;  %v2809_v3 = vld [vmem:[#allocation2 + $0x240] sm:$0xf] }
  0x65   : >> { %v2713_v25 = vor.u32 %v3461_v14, %v2710_v17  ;;  %v3487_v4 = vld [vmem:[#allocation2 + $0x244] sm:$0xf0]  ;;  %v3502_v5 = vld [vmem:[#allocation2 + $0x2c4] sm:$0xf]  ;;  %v2998_v9 = vld [vmem:[#allocation2 + $0x3b0] sm:$0xf]  ;;  %v4010_v27 = vpack.c.b16 %v988_v15, %v988_v15 }
  0x66   : >> { %904 = vmatmul.bf16.vlgmr.msra.gmra.mxu3 %v764_v7  ;;  %2802 = vmatmul.msk.bf16.vlgmr.msra.gmra.mxu1 %vm478_vm0, %v3995_v8  ;;  %v3534_v10 = vld [vmem:[#allocation2 + $0x3b4] sm:$0xf0]  ;;  %v3525_v14 = vld [vmem:[#allocation2 + $0x374] sm:$0xf]  ;;  %v2968_v63 = vld [vmem:[#allocation2 + $0x378] sm:$0xf0] }
  0x67   : >> { %940 = vmatpush.bf16.msra.mxu0 %v2793_v50  ;;  %1133 = vmatpush.bf16.msrb.mxu3 %v2898_v62  ;;  %v2967_v50 = vor.u32 %v3526_v38, %v2966_v37  ;;  %v4001_v62 = vld [vmem:[%s3961_s12 + $0x8] sm:$0xf]  ;;  %v3522_v11 = vld [vmem:[#allocation2 + $0x354] sm:$0xf0]  ;;  %v3492_v17 = vld [vmem:[#allocation2 + $0x274] sm:$0xf]  ;;  %v2999_v20 = vor.u32 %v3534_v10, %v2998_v9  ;;  %v2971_v23 = vor.u32 %v3525_v14, %v2968_v63 }
  0x68   : >> { %1117 = vmatpush.bf16.msrb.mxu1 %v2858_v33  ;;  %927 = vmatpush.bf16.msra.mxu2 %v2729_v61  ;;  %v3491_v33 = vld [vmem:[#allocation2 + $0x264] sm:$0xf0]  ;;  %v3494_v61 = vld [vmem:[#allocation2 + $0x284] sm:$0xf]  ;;  %v2835_v18 = vld [vmem:[#allocation2 + $0x278] sm:$0xf0] }
  0x69   : >> { %v2826_v40 = vor.u32 %v3491_v33, %v2825_v32  ;;  %v2942_v22 = vld [vmem:[#allocation2 + $0x340] sm:$0xf]  ;;  %v2838_v28 = vor.u32 %v3492_v17, %v2835_v18  ;;  %v2960_v30 = vld [vmem:[#allocation2 + $0x368] sm:$0xf0]  ;;  %v2934_v33 = vld [vmem:[#allocation2 + $0x330] sm:$0xf] }
  0x6a   : >> { %v2827_v32 = vld [vmem:[#allocation2 + $0x268] sm:$0xf0]  ;;  %v4012_v35 = vld.sshfl [vmem:[#allocation1] sm:$0xff pattern:$0x73625140]  ;;  %s283_s8 = sadd.s32 1, %s3840_s8  }
  0x6b   : >> { %941 = vmatpush.bf16.msra.mxu0 %v2785_v6  ;;  %1134 = vmatpush.bf16.msrb.mxu3 %v2890_v16  ;;  %v2810_v16 = vor.u32 %v3487_v4, %v2809_v3  ;;  %v4014_v36 = vld.sshfl [vmem:[#allocation1 + $0x8] sm:$0xff pattern:$0x73625140]  ;;  %v3518_v41 = vld [vmem:[#allocation2 + $0x334] sm:$0xf0]  ;;  %p280_p1 = scmp.ge.s32.totalorder %s283_s8, 4  }
  0x6c   : >> { %1118 = vmatpush.bf16.msrb.mxu1 %v2850_v57  ;;  %928 = vmatpush.bf16.msra.mxu2 %v2721_v12  ;;  %v3524_v57 = vld [vmem:[#allocation2 + $0x364] sm:$0xf0]  ;;  %v4005_v12 = vpack.c.b16 %v989_v59, %v989_v59  ;;  %v3521_v45 = vld [vmem:[#allocation2 + $0x354] sm:$0xf]  ;;  %v2819_v48 = vld [vmem:[#allocation2 + $0x258] sm:$0xf0] }
  0x6d   : >> { %v2959_v6 = vor.u32 %v3524_v57, %v2958_v56  ;;  %v2926_v49 = vld [vmem:[#allocation2 + $0x320] sm:$0xf]  ;;  %v2935_v56 = vor.u32 %v3518_v41, %v2934_v33  ;;  %v3519_v59 = vld [vmem:[#allocation2 + $0x344] sm:$0xf]  ;;  %v2811_v3 = vld [vmem:[#allocation2 + $0x248] sm:$0xf0] }
  0x6e   : >> { %v2974_v55 = vld [vmem:[#allocation2 + $0x380] sm:$0xf]  ;;  %v3533_v4 = vld [vmem:[#allocation2 + $0x3b4] sm:$0xf]  ;;  %s3637_s29 = smul.u32 (%p280_p1), 48, %s3828_s18  ;;  %s2352_s30 = sshll.u32 (%p280_p1), %s256_s7, 4  ;;  %s2353_s30 = int_to_ptr.vmem [resolvable:$true] %s2352_s30 }
  0x6f   : >> { %942 = vmatpush.bf16.msra.mxu0 %v2777_v21  ;;  %1135 = vmatpush.bf16.msrb.mxu3 %v2882_v29  ;;  %v2951_v21 = vor.u32 %v3522_v11, %v2950_v1  ;;  %v3523_v29 = vld [vmem:[#allocation2 + $0x364] sm:$0xf]  ;;  %v3550_v1 = vld [vmem:[#allocation2 + $0x434] sm:$0xf0]  ;;  %v2918_v11 = vld [vmem:[#allocation2 + $0x310] sm:$0xf] }
  0x70   : >> { %1119 = vmatpush.bf16.msrb.mxu1 %v2842_v13  ;;  %929 = vmatpush.bf16.msra.mxu2 %v2713_v25  ;;  %v2846_v13 = vor.u32 %v3494_v61, %v2843_v54  ;;  %v3532_v25 = vld [vmem:[#allocation2 + $0x3a4] sm:$0xf0]  ;;  %v2963_v38 = vor.u32 %v3523_v29, %v2960_v30  ;;  %v3065_v54 = vld [vmem:[#allocation2 + $0x430] sm:$0xf]  ;;  %v3517_v15 = vld [vmem:[#allocation2 + $0x334] sm:$0xf]  ;;  %s2351_s12 = scalar_lea.hbm (%p280_p1), %s4190_s4, %s3637_s29 }
  0x71   : >> { %v3066_v14 = vor.u32 %v3550_v1, %v3065_v54  ;;  %v3057_v18 = vld [vmem:[#allocation2 + $0x420] sm:$0xf]  ;;  %v3558_v29 = vld [vmem:[#allocation2 + $0x474] sm:$0xf0]  ;;  %v3529_v33 = vld [vmem:[#allocation2 + $0x394] sm:$0xf] }
  0x72   : >> { %2803 = vmatmul.msk.bf16.vlgmr.msra.gmra.mxu0 %vm478_vm0, %v3995_v8  ;;  %v1852_v8 = vunpack.c.l.bf16 %v4001_v62  ;;  %v3089_v41 = vld [vmem:[#allocation2 + $0x460] sm:$0xf]  ;;  %v3511_v54 = vld [vmem:[#allocation2 + $0x304] sm:$0xf]  ;;  %v2912_v1 = vld [vmem:[#allocation2 + $0x308] sm:$0xf0] }
  0x73   : >> { %1142 = vmatpush.bf16.msrb.mxu0 %v2870_v24  ;;  %930 = vmatmul.bf16.vlgmr.msra.gmra.mxu2 %v764_v7  ;;  %v2875_v7 = vld [vmem:[#allocation2 + $0x2c8] sm:$0xf0]  ;;  %v2990_v24 = vld [vmem:[#allocation2 + $0x3a0] sm:$0xf]  ;;  %s2354_s13 = sshll.u32 (%p280_p1), %s2351_s12, 4  ;;  %s3770_s11 = scalar_lea.hbm (%p280_p1), %s4190_s4, 96  ;;  %s2355_s13 = int_to_ptr.hbm [resolvable:$true] %s2354_s13 }
  0x74   : >> { %1120 = vmatpush.bf16.msrb.mxu1 %v2834_v26  ;;  %1159 = vmatpush.bf16.msrb.mxu2 %v2902_v31  ;;  %v2878_v19 = vor.u32 %v3502_v5, %v2875_v7  ;;  %v3520_v26 = vld [vmem:[#allocation2 + $0x344] sm:$0xf0]  ;;  %v3490_v31 = vld [vmem:[#allocation2 + $0x264] sm:$0xf]  ;;  %v2991_v34 = vor.u32 %v3532_v25, %v2990_v24  ;;  %1854 = vst [vmem:[#allocation1] ss:$2 sm:$0xff] %v1852_v8 }
  0x75   : >> { %1136 = vmatpush.bf16.msrb.mxu3 %v2874_v46  ;;  %v2943_v37 = vor.u32 %v3520_v26, %v2942_v22  ;;  %v2830_v44 = vor.u32 %v3490_v31, %v2827_v32  ;;  %v2952_v46 = vld [vmem:[#allocation2 + $0x358] sm:$0xf0]  ;;  %v2992_v8 = vld [vmem:[#allocation2 + $0x3a8] sm:$0xf0]  ;;  %v2910_v22 = vld [vmem:[#allocation2 + $0x300] sm:$0xf] }
  0x76   : >> { %v2955_v57 = vor.u32 %v3521_v45, %v2952_v46  ;;  %v3000_v5 = vld [vmem:[#allocation2 + $0x3b8] sm:$0xf0]  ;;  %v3515_v26 = vld [vmem:[#allocation2 + $0x324] sm:$0xf]  ;;  %v3049_v31 = vld [vmem:[#allocation2 + $0x410] sm:$0xf] }
  0x77   : >> { %1143 = vmatpush.bf16.msrb.mxu0 %v2862_v39  ;;  %v2982_v39 = vld [vmem:[#allocation2 + $0x390] sm:$0xf]  ;;  %v3003_v17 = vor.u32 %v3533_v4, %v3000_v5  ;;  %v3546_v32 = vld [vmem:[#allocation2 + $0x414] sm:$0xf0]  ;;  %v3513_v45 = vld [vmem:[#allocation2 + $0x314] sm:$0xf] }
  0x78   : >> { %1121 = vmatpush.bf16.msrb.mxu1 %v2826_v40  ;;  %1160 = vmatpush.bf16.msrb.mxu2 %v2894_v47  ;;  %v3530_v40 = vld [vmem:[#allocation2 + $0x394] sm:$0xf0]  ;;  %v3488_v47 = vld [vmem:[#allocation2 + $0x254] sm:$0xf]  ;;  %v2920_v46 = vld [vmem:[#allocation2 + $0x318] sm:$0xf0] }
  0x79   : >> { %1337 = vmatpush.bf16.msra.mxu3 %v2967_v50  ;;  %v3516_v50 = vld [vmem:[#allocation2 + $0x324] sm:$0xf0]  ;;  %v2983_v53 = vor.u32 %v3530_v40, %v2982_v39  ;;  %v2822_v61 = vor.u32 %v3488_v47, %v2819_v48  ;;  %v4025_v39 = vld [vmem:[%s3976_s14 + $0x8] sm:$0x77]  ;;  %v3033_v4 = vld [vmem:[#allocation2 + $0x3f0] sm:$0xf] }
  0x7a   : >> { %2903 = vmatmul.msk.bf16.vlgmr.msrb.gmra.mxu3 %vm478_vm0, %v4005_v12  ;;  %v2927_v10 = vor.u32 %v3516_v50, %v2926_v49  ;;  %v3556_v47 = vld [vmem:[#allocation2 + $0x464] sm:$0xf0]  ;;  %v3041_v49 = vld [vmem:[#allocation2 + $0x400] sm:$0xf]  ;;  %v3542_v5 = vld [vmem:[#allocation2 + $0x3f4] sm:$0xf0] }
  0x7b   : >> { %1144 = vmatpush.bf16.msrb.mxu0 %v2854_v58  ;;  %v3528_v58 = vld [vmem:[#allocation2 + $0x384] sm:$0xf0]  ;;  %v4019_v7 = vld.sshfl [vmem:[#allocation1] sm:$0xff pattern:$0x75316420] }
  0x7c   : >> { %1122 = vmatpush.bf16.msrb.mxu1 %v2818_v60  ;;  %1161 = vmatpush.bf16.msrb.mxu2 %v2886_v2  ;;  %v2944_v60 = vld [vmem:[#allocation2 + $0x348] sm:$0xf0]  ;;  %v3486_v2 = vld [vmem:[#allocation2 + $0x244] sm:$0xf]  ;;  %v3544_v50 = vld [vmem:[#allocation2 + $0x404] sm:$0xf0] }
  0x7d   : >> { %1338 = vmatpush.bf16.msra.mxu3 %v2959_v6  ;;  %v2975_v6 = vor.u32 %v3528_v58, %v2974_v55  ;;  %v4021_v9 = vld.sshfl [vmem:[#allocation1 + $0x8] sm:$0xff pattern:$0x75316420]  ;;  %v2814_v63 = vor.u32 %v3486_v2, %v2811_v3  ;;  %v2976_v55 = vld [vmem:[#allocation2 + $0x388] sm:$0xf0] }
  0x7e   : >> { %1888 = vst [vmem:[#allocation1] ss:$4 sm:$0xff] %v4001_v62  ;;  %v3097_v62 = vld [vmem:[#allocation2 + $0x470] sm:$0xf]  ;;  %v3549_v58 = vld [vmem:[#allocation2 + $0x434] sm:$0xf] }
  0x7f   : >> { %1145 = vmatpush.bf16.msrb.mxu0 %v2846_v13  ;;  %v2947_v13 = vor.u32 %v3519_v59, %v2944_v60  ;;  %v3098_v40 = vor.u32 %v3558_v29, %v3097_v62  ;;  %v3090_v59 = vor.u32 %v3556_v47, %v3089_v41  ;;  %v3081_v60 = vld [vmem:[#allocation2 + $0x450] sm:$0xf]  ;;  %v3554_v2 = vld [vmem:[#allocation2 + $0x454] sm:$0xf0]  ;;  %v3555_v62 = vld [vmem:[#allocation2 + $0x464] sm:$0xf] }
  0x80   : >> { %1123 = vmatpush.bf16.msrb.mxu1 %v2810_v16  ;;  %1162 = vmatpush.bf16.msrb.mxu2 %v2878_v19  ;;  %v2936_v16 = vld [vmem:[#allocation2 + $0x338] sm:$0xf0]  ;;  %v3548_v19 = vld [vmem:[#allocation2 + $0x424] sm:$0xf0]  ;;  %v3538_v41 = vld [vmem:[#allocation2 + $0x3d4] sm:$0xf0] }
  0x81   : >> { %1339 = vmatpush.bf16.msra.mxu3 %v2951_v21  ;;  %v2939_v24 = vor.u32 %v3517_v15, %v2936_v16  ;;  %v3058_v25 = vor.u32 %v3548_v19, %v3057_v18  ;;  %v1431_v15 = vunpack.c.l.b16 %v4025_v39  ;;  %v3082_v16 = vor.u32 %v3554_v2, %v3081_v60  ;;  %v3552_v18 = vld [vmem:[#allocation2 + $0x444] sm:$0xf0]  ;;  %v3166_v19 = vld [vmem:[#allocation2 + $0x4f0] sm:$0xf]  ;;  %v3551_v60 = vld [vmem:[#allocation2 + $0x444] sm:$0xf] }
  0x82   : >> { %v3583_v2 = vld [vmem:[#allocation2 + $0x534] sm:$0xf0] }
  0x83   : >> { %1124 = vmatmul.bf16.vlgmr.msrb.gmra.mxu1 %v4010_v27  ;;  %1146 = vmatpush.bf16.msrb.mxu0 %v2838_v28  ;;  %v2928_v28 = vld [vmem:[#allocation2 + $0x328] sm:$0xf0] }
  0x84   : >> { %1354 = vmatpush.bf16.msra.mxu1 %v2999_v20  ;;  %1363 = vmatpush.bf16.msra.mxu2 %v2971_v23  ;;  %v3531_v20 = vld [vmem:[#allocation2 + $0x3a4] sm:$0xf]  ;;  %v3512_v23 = vld [vmem:[#allocation2 + $0x304] sm:$0xf0] }
  0x85   : >> { %1340 = vmatpush.bf16.msra.mxu3 %v2943_v37  ;;  %2904 = vmatmul.msk.bf16.vlgmr.msrb.gmra.mxu2 %vm478_vm0, %v4005_v12  ;;  %v3514_v12 = vld [vmem:[#allocation2 + $0x314] sm:$0xf0]  ;;  %v2995_v30 = vor.u32 %v3531_v20, %v2992_v8  ;;  %v2911_v37 = vor.u32 %v3512_v23, %v2910_v22  ;;  %v3034_v20 = vor.u32 %v3542_v5, %v3033_v4  ;;  %v3025_v22 = vld [vmem:[#allocation2 + $0x3e0] sm:$0xf]  ;;  %v3540_v23 = vld [vmem:[#allocation2 + $0x3e4] sm:$0xf0] }
  0x86   : >> { %v2919_v21 = vor.u32 %v3514_v12, %v2918_v11  ;;  %v3099_v11 = vld [vmem:[#allocation2 + $0x478] sm:$0xf0]  ;;  %v2915_v12 = vor.u32 %v3511_v54, %v2912_v1  ;;  %v3575_v8 = vld [vmem:[#allocation2 + $0x4f4] sm:$0xf0]  ;;  %v3075_v54 = vld [vmem:[#allocation2 + $0x448] sm:$0xf0] }
  0x87   : >> { %1147 = vmatpush.bf16.msrb.mxu0 %v2830_v44  ;;  %v3050_v44 = vor.u32 %v3546_v32, %v3049_v31  ;;  %v3026_v31 = vor.u32 %v3540_v23, %v3025_v22  ;;  %v3545_v32 = vld [vmem:[#allocation2 + $0x414] sm:$0xf]  ;;  %v3198_v1 = vld [vmem:[#allocation2 + $0x530] sm:$0xf]  ;;  %v3168_v5 = vld [vmem:[#allocation2 + $0x4f8] sm:$0xf0] }
  0x88   : >> { %1355 = vmatpush.bf16.msra.mxu1 %v2991_v34  ;;  %1364 = vmatpush.bf16.msra.mxu2 %v2963_v38  ;;  %v2984_v34 = vld [vmem:[#allocation2 + $0x398] sm:$0xf0]  ;;  %v2931_v38 = vor.u32 %v3515_v26, %v2928_v28  ;;  %v4033_v28 = vpack.c.b16 %v1431_v15, %v1431_v15  ;;  %v3574_v4 = vld [vmem:[#allocation2 + $0x4f4] sm:$0xf]  ;;  %v3569_v15 = vld [vmem:[#allocation2 + $0x4c4] sm:$0xf0] }
  0x89   : >> { %1341 = vmatpush.bf16.msra.mxu3 %v2935_v56  ;;  %v2987_v48 = vor.u32 %v3529_v33, %v2984_v34  ;;  %v1432_v56 = vunpack.c.h.b16 %v4025_v39  ;;  %v3051_v33 = vld [vmem:[#allocation2 + $0x418] sm:$0xf0]  ;;  %v3167_v34 = vor.u32 %v3575_v8, %v3166_v19  ;;  %v3581_v8 = vld [vmem:[#allocation2 + $0x524] sm:$0xf0]  ;;  %v3160_v22 = vld [vmem:[#allocation2 + $0x4e8] sm:$0xf0] }
  0x8a   : >> { %v3539_v23 = vld [vmem:[#allocation2 + $0x3e4] sm:$0xf] }
  0x8b   : >> { %1148 = vmatpush.bf16.msrb.mxu0 %v2822_v61  ;;  %v3042_v61 = vor.u32 %v3544_v50, %v3041_v49  ;;  %v1438_v49 = vshll.u32 %v4033_v28, 16  ;;  %v3150_v50 = vld [vmem:[#allocation2 + $0x4d0] sm:$0xf] }
  0x8c   : >> { %1356 = vmatpush.bf16.msra.mxu1 %v2983_v53  ;;  %1365 = vmatpush.bf16.msra.mxu2 %v2955_v57  ;;  %v3527_v53 = vld [vmem:[#allocation2 + $0x384] sm:$0xf]  ;;  %v2923_v57 = vor.u32 %v3513_v45, %v2920_v46  ;;  %v3083_v45 = vld [vmem:[#allocation2 + $0x458] sm:$0xf0] }
  0x8d   : >> { %1342 = vmatpush.bf16.msra.mxu3 %v2927_v10  ;;  %v2979_v3 = vor.u32 %v3527_v53, %v2976_v55  ;;  %v3557_v10 = vld [vmem:[#allocation2 + $0x474] sm:$0xf]  ;;  %v3571_v53 = vld [vmem:[#allocation2 + $0x4d4] sm:$0xf0] }
  0x8f   : >> { %1149 = vmatpush.bf16.msrb.mxu0 %v2814_v63  ;;  %v3059_v63 = vld [vmem:[#allocation2 + $0x428] sm:$0xf0] }
  0x90   : >> { %1357 = vmatpush.bf16.msra.mxu1 %v2975_v6  ;;  %1366 = vmatpush.bf16.msra.mxu2 %v2947_v13  ;;  %v1434_v13 = vpack.c.b16 %v1432_v56, %v1432_v56  ;;  %v3543_v56 = vld [vmem:[#allocation2 + $0x404] sm:$0xf] }
  0x91   : >> { %1343 = vmatpush.bf16.msra.mxu3 %v2919_v21  ;;  %v3102_v21 = vor.u32 %v3557_v10, %v3099_v11  ;;  %v1440_v10 = vrot.slane %v1438_v49, 1 }
  0x92   : >> { %1150 = vmatmul.bf16.vlgmr.msrb.gmra.mxu0 %v4010_v27  ;;  %v3067_v27 = vld [vmem:[#allocation2 + $0x438] sm:$0xf0]  ;;  %v1445_v26 = vshll.u32 %v1434_v13, 16  ;;  %v1443_v46 = vshrl.u32 %v1434_v13, 16  ;;  %v3541_v13 = vld [vmem:[#allocation2 + $0x3f4] sm:$0xf] }
  0x93   : >> { %1380 = vmatpush.bf16.msra.mxu0 %v3003_v17  ;;  %3004 = vmatmul.msk.bf16.vlgmr.msra.gmra.mxu1 %vm478_vm0, %v4014_v36  ;;  %v3070_v6 = vor.u32 %v3549_v58, %v3067_v27  ;;  %v3073_v17 = vld [vmem:[#allocation2 + $0x440] sm:$0xf] }
  0x94   : >> { %1573 = vmatpush.bf16.msrb.mxu1 %v3066_v14  ;;  %1367 = vmatpush.bf16.msra.mxu2 %v2939_v24  ;;  %v3547_v14 = vld [vmem:[#allocation2 + $0x424] sm:$0xf]  ;;  %v3074_v29 = vor.u32 %v3552_v18, %v3073_v17  ;;  %v1447_v47 = vrot.slane %v1445_v26, 1  ;;  %v3171_v17 = vor.u32 %v3574_v4, %v3168_v5  ;;  %v3190_v18 = vld [vmem:[#allocation2 + $0x520] sm:$0xf] }
  0x95   : >> { %1344 = vmatpush.bf16.msra.mxu3 %v2911_v37  ;;  %v3062_v24 = vor.u32 %v3547_v14, %v3059_v63  ;;  %v3573_v37 = vld [vmem:[#allocation2 + $0x4e4] sm:$0xf0]  ;;  %v3151_v14 = vor.u32 %v3571_v53, %v3150_v50  ;;  %v3142_v63 = vld [vmem:[#allocation2 + $0x4c0] sm:$0xf]  ;;  %v3567_v26 = vld [vmem:[#allocation2 + $0x4b4] sm:$0xf0] }
  0x96   : >> { %v3568_v50 = vld [vmem:[#allocation2 + $0x4c4] sm:$0xf]  ;;  %v3144_v53 = vld [vmem:[#allocation2 + $0x4c8] sm:$0xf0]  ;;  %v3566_v5 = vld [vmem:[#allocation2 + $0x4b4] sm:$0xf] }
  0x97   : >> { %1381 = vmatpush.bf16.msra.mxu0 %v2995_v30  ;;  %v3158_v30 = vld [vmem:[#allocation2 + $0x4e0] sm:$0xf]  ;;  %v4050_v4 = vld [vmem:[%s3976_s14 + $0x10] sm:$0x33] }
  0x98   : >> { %1574 = vmatpush.bf16.msrb.mxu1 %v3058_v25  ;;  %1368 = vmatpush.bf16.msra.mxu2 %v2931_v38  ;;  %v3091_v25 = vld [vmem:[#allocation2 + $0x468] sm:$0xf0]  ;;  %v3159_v58 = vor.u32 %v3573_v37, %v3158_v30  ;;  %v3182_v30 = vld [vmem:[#allocation2 + $0x510] sm:$0xf]  ;;  %v3537_v37 = vld [vmem:[#allocation2 + $0x3d4] sm:$0xf] }
  0x99   : >> { %1590 = vmatpush.bf16.msrb.mxu3 %v3098_v40  ;;  %v3094_v38 = vor.u32 %v3555_v62, %v3091_v25  ;;  %v3017_v40 = vld [vmem:[#allocation2 + $0x3d0] sm:$0xf]  ;;  %v3143_v62 = vor.u32 %v3569_v15, %v3142_v63  ;;  %v3192_v63 = vld [vmem:[#allocation2 + $0x528] sm:$0xf0]  ;;  %v3110_v15 = vld [vmem:[#allocation2 + $0x480] sm:$0xf] }
  0x9a   : >> { %1345 = vmatmul.bf16.vlgmr.msra.gmra.mxu3 %v4012_v35  ;;  %v3018_v55 = vor.u32 %v3538_v41, %v3017_v40  ;;  %v3134_v25 = vld [vmem:[#allocation2 + $0x4b0] sm:$0xf]  ;;  %v3126_v41 = vld [vmem:[#allocation2 + $0x4a0] sm:$0xf] }
  0x9b   : >> { %1382 = vmatpush.bf16.msra.mxu0 %v2987_v48  ;;  %v3054_v48 = vor.u32 %v3545_v32, %v3051_v33  ;;  %v3579_v32 = vld [vmem:[#allocation2 + $0x514] sm:$0xf0]  ;;  %v3570_v33 = vld [vmem:[#allocation2 + $0x4d4] sm:$0xf]  ;;  %v3135_v40 = vor.u32 %v3567_v26, %v3134_v25  ;;  %v3251_v25 = vld [vmem:[#allocation2 + $0x590] sm:$0xf] }
  0x9c   : >> { %1575 = vmatpush.bf16.msrb.mxu1 %v3050_v44  ;;  %1369 = vmatpush.bf16.msra.mxu2 %v2923_v57  ;;  %v3553_v44 = vld [vmem:[#allocation2 + $0x454] sm:$0xf]  ;;  %v3043_v57 = vld [vmem:[#allocation2 + $0x408] sm:$0xf0]  ;;  %v3596_v26 = vld [vmem:[#allocation2 + $0x594] sm:$0xf0] }
  0x9d   : >> { %1591 = vmatpush.bf16.msrb.mxu3 %v3090_v59  ;;  %v3086_v27 = vor.u32 %v3553_v44, %v3083_v45  ;;  %v3536_v59 = vld [vmem:[#allocation2 + $0x3c4] sm:$0xf0]  ;;  %v3183_v45 = vor.u32 %v3579_v32, %v3182_v30  ;;  %v3184_v30 = vld [vmem:[#allocation2 + $0x518] sm:$0xf0]  ;;  %v3291_v32 = vld [vmem:[#allocation2 + $0x5e0] sm:$0xf] }
  0x9e   : >> { %v3565_v44 = vld [vmem:[#allocation2 + $0x4a4] sm:$0xf0] }
  0x9f   : >> { %1383 = vmatpush.bf16.msra.mxu0 %v2979_v3  ;;  %v3046_v3 = vor.u32 %v3543_v56, %v3043_v57  ;;  %v3600_v56 = vld [vmem:[#allocation2 + $0x5b4] sm:$0xf0]  ;;  %v3535_v57 = vld [vmem:[#allocation2 + $0x3c4] sm:$0xf] }
  0xa0   : >> { %1576 = vmatpush.bf16.msrb.mxu1 %v3042_v61  ;;  %1370 = vmatpush.bf16.msra.mxu2 %v2915_v12  ;;  %v4039_v61 = vor.u32 %v1447_v47, %v1443_v46  ;;  %v3035_v12 = vld [vmem:[#allocation2 + $0x3f8] sm:$0xf0]  ;;  %v3174_v47 = vld [vmem:[#allocation2 + $0x500] sm:$0xf] }
  0xa1   : >> { %1592 = vmatpush.bf16.msrb.mxu3 %v3082_v16  ;;  %v3199_v16 = vor.u32 %v3583_v2, %v3198_v1  ;;  %v3147_v2 = vor.u32 %v3568_v50, %v3144_v53  ;;  %v3604_v50 = vld [vmem:[#allocation2 + $0x5d4] sm:$0xf0] }
  0xa2   : >> { %3005 = vmatmul.msk.bf16.vlgmr.msra.gmra.mxu0 %vm478_vm0, %v4014_v36  ;;  %v3078_v36 = vor.u32 %v3551_v60, %v3075_v54  ;;  %v3118_v60 = vld [vmem:[#allocation2 + $0x490] sm:$0xf]  ;;  %v3563_v54 = vld [vmem:[#allocation2 + $0x494] sm:$0xf0] }
  0xa3   : >> { %1599 = vmatpush.bf16.msrb.mxu0 %v3070_v6  ;;  %1371 = vmatmul.bf16.vlgmr.msra.gmra.mxu2 %v4012_v35  ;;  %v3009_v35 = vld [vmem:[#allocation2 + $0x3c0] sm:$0xf]  ;;  %v1436_v6 = vshrl.u32 %v4033_v28, 16  ;;  %v3191_v28 = vor.u32 %v3581_v8, %v3190_v18 }
  0xa4   : >> { %1577 = vmatpush.bf16.msrb.mxu1 %v3034_v20  ;;  %1616 = vmatpush.bf16.msrb.mxu2 %v3102_v21  ;;  %v3010_v11 = vor.u32 %v3536_v59, %v3009_v35  ;;  %v3038_v20 = vor.u32 %v3541_v13, %v3035_v12  ;;  %v3572_v21 = vld [vmem:[#allocation2 + $0x4e4] sm:$0xf]  ;;  %v3582_v35 = vld [vmem:[#allocation2 + $0x534] sm:$0xf]  ;;  %v3200_v59 = vld [vmem:[#allocation2 + $0x538] sm:$0xf0]  ;;  %v1666_v12 = vunpack.c.h.b16 %v4050_v4 }
  0xa5   : >> { %1593 = vmatpush.bf16.msrb.mxu3 %v3074_v29  ;;  %v4044_v19 = vor.u32 %v1440_v10, %v1436_v6  ;;  %v3163_v29 = vor.u32 %v3572_v21, %v3160_v22  ;;  %v3136_v6 = vld [vmem:[#allocation2 + $0x4b8] sm:$0xf0]  ;;  %v3203_v10 = vor.u32 %v3582_v35, %v3200_v59  ;;  %v3598_v13 = vld [vmem:[#allocation2 + $0x5a4] sm:$0xf0]  ;;  %v3564_v21 = vld [vmem:[#allocation2 + $0x4a4] sm:$0xf] }
  0xa6   : >> { %v3139_v18 = vor.u32 %v3566_v5, %v3136_v6  ;;  %v3128_v22 = vld [vmem:[#allocation2 + $0x4a8] sm:$0xf0]  ;;  %v3235_v35 = vld [vmem:[#allocation2 + $0x570] sm:$0xf]  ;;  %v3597_v5 = vld [vmem:[#allocation2 + $0x5a4] sm:$0xf] }
  0xa7   : >> { %1600 = vmatpush.bf16.msrb.mxu0 %v3062_v24  ;;  %v3027_v24 = vld [vmem:[#allocation2 + $0x3e8] sm:$0xf0] }
  0xa8   : >> { %1578 = vmatpush.bf16.msrb.mxu1 %v3026_v31  ;;  %1617 = vmatpush.bf16.msrb.mxu2 %v3094_v38  ;;  %v3030_v31 = vor.u32 %v3539_v23, %v3027_v24  ;;  %v3019_v38 = vld [vmem:[#allocation2 + $0x3d8] sm:$0xf0]  ;;  %v1665_v23 = vunpack.c.l.b16 %v4050_v4  ;;  %v3261_v6 = vld [vmem:[#allocation2 + $0x5a8] sm:$0xf0] }
  0xa9   : >> { %1793 = vmatpush.bf16.msra.mxu3 %v3167_v34  ;;  %v3152_v34 = vld [vmem:[#allocation2 + $0x4d8] sm:$0xf0]  ;;  %v3022_v49 = vor.u32 %v3537_v37, %v3019_v38  ;;  %v3252_v37 = vor.u32 %v3596_v26, %v3251_v25  ;;  %v3562_v38 = vld [vmem:[#allocation2 + $0x494] sm:$0xf]  ;;  %v3622_v25 = vld [vmem:[#allocation2 + $0x664] sm:$0xf0] }
  0xaa   : >> { %3103 = vmatmul.msk.bf16.vlgmr.msrb.gmra.mxu3 %vm478_vm0, %v4039_v61  ;;  %v3155_v46 = vor.u32 %v3570_v33, %v3152_v34  ;;  %v3131_v33 = vor.u32 %v3564_v21, %v3128_v22  ;;  %v3606_v34 = vld [vmem:[#allocation2 + $0x5e4] sm:$0xf0]  ;;  %v3253_v21 = vld [vmem:[#allocation2 + $0x598] sm:$0xf0] }
  0xab   : >> { %1601 = vmatpush.bf16.msrb.mxu0 %v3054_v48  ;;  %v3577_v48 = vld [vmem:[#allocation2 + $0x504] sm:$0xf0] }
  0xac   : >> { %1579 = vmatpush.bf16.msrb.mxu1 %v3018_v55  ;;  %1618 = vmatpush.bf16.msrb.mxu2 %v3086_v27  ;;  %v3267_v55 = vld [vmem:[#allocation2 + $0x5b0] sm:$0xf]  ;;  %v3127_v27 = vor.u32 %v3565_v44, %v3126_v41  ;;  %v3175_v1 = vor.u32 %v3577_v48, %v3174_v47  ;;  %v4057_v41 = vpack.c.b16 %v1665_v23, %v1665_v23  ;;  %v3576_v48 = vld [vmem:[#allocation2 + $0x504] sm:$0xf]  ;;  %v3358_v23 = vld [vmem:[#allocation2 + $0x660] sm:$0xf] }
  0xad   : >> { %1794 = vmatpush.bf16.msra.mxu3 %v3159_v58  ;;  %v3011_v58 = vld [vmem:[#allocation2 + $0x3c8] sm:$0xf0]  ;;  %v3283_v47 = vld [vmem:[#allocation2 + $0x5d0] sm:$0xf] }
  0xaf   : >> { %1602 = vmatpush.bf16.msrb.mxu0 %v3046_v3  ;;  %v3268_v3 = vor.u32 %v3600_v56, %v3267_v55  ;;  %v3599_v55 = vld [vmem:[#allocation2 + $0x5b4] sm:$0xf]  ;;  %v3269_v56 = vld [vmem:[#allocation2 + $0x5b8] sm:$0xf0] }
  0xb0   : >> { %1580 = vmatpush.bf16.msrb.mxu1 %v3010_v11  ;;  %1619 = vmatpush.bf16.msrb.mxu2 %v3078_v36  ;;  %v3259_v11 = vld [vmem:[#allocation2 + $0x5a0] sm:$0xf]  ;;  %v3580_v36 = vld [vmem:[#allocation2 + $0x524] sm:$0xf] }
  0xb1   : >> { %1795 = vmatpush.bf16.msra.mxu3 %v3151_v14  ;;  %v3119_v14 = vor.u32 %v3563_v54, %v3118_v60  ;;  %v3260_v8 = vor.u32 %v3598_v13, %v3259_v11  ;;  %v3195_v24 = vor.u32 %v3580_v36, %v3192_v63  ;;  %v3592_v60 = vld [vmem:[#allocation2 + $0x574] sm:$0xf0]  ;;  %v3607_v54 = vld [vmem:[#allocation2 + $0x5f4] sm:$0xf]  ;;  %v3602_v11 = vld [vmem:[#allocation2 + $0x5c4] sm:$0xf0] }
  0xb2   : >> { %v3366_v13 = vld [vmem:[#allocation2 + $0x670] sm:$0xf]  ;;  %v3624_v36 = vld [vmem:[#allocation2 + $0x674] sm:$0xf0]  ;;  %v3227_v63 = vld [vmem:[#allocation2 + $0x560] sm:$0xf] }
  0xb3   : >> { %1581 = vmatmul.bf16.vlgmr.msrb.gmra.mxu1 %v4044_v19  ;;  %1603 = vmatpush.bf16.msrb.mxu0 %v3038_v20  ;;  %v3608_v20 = vld [vmem:[#allocation2 + $0x5f4] sm:$0xf0]  ;;  %v3367_v22 = vor.u32 %v3624_v36, %v3366_v13  ;;  %v4075_v13 = vld [vmem:[#allocation2 + $0x664] sm:$0xf] }
  0xb4   : >> { %1810 = vmatpush.bf16.msra.mxu1 %v3199_v16  ;;  %1819 = vmatpush.bf16.msra.mxu2 %v3171_v17  ;;  %v3561_v16 = vld [vmem:[#allocation2 + $0x484] sm:$0xf0]  ;;  %v3299_v17 = vld [vmem:[#allocation2 + $0x5f0] sm:$0xf] }
  0xb5   : >> { %1796 = vmatpush.bf16.msra.mxu3 %v3143_v62  ;;  %3104 = vmatmul.msk.bf16.vlgmr.msrb.gmra.mxu2 %vm478_vm0, %v4039_v61  ;;  %v3014_v61 = vor.u32 %v3535_v57, %v3011_v58  ;;  %v4054_v62 = vpack.c.b16 %v1666_v12, %v1666_v12  ;;  %v3560_v58 = vld [vmem:[#allocation2 + $0x484] sm:$0xf]  ;;  %v3236_v12 = vor.u32 %v3592_v60, %v3235_v35  ;;  %v3632_v35 = vld [vmem:[#allocation2 + $0x6b4] sm:$0xf0]  ;;  %v3591_v60 = vld [vmem:[#allocation2 + $0x574] sm:$0xf] }
  0xb7   : >> { %1604 = vmatpush.bf16.msrb.mxu0 %v3030_v31  ;;  %v3300_v31 = vor.u32 %v3608_v20, %v3299_v17  ;;  %v3605_v17 = vld [vmem:[#allocation2 + $0x5e4] sm:$0xf] }
  0xb8   : >> { %1811 = vmatpush.bf16.msra.mxu1 %v3191_v28  ;;  %1820 = vmatpush.bf16.msra.mxu2 %v3163_v29  ;;  %v3111_v28 = vor.u32 %v3561_v16, %v3110_v15  ;;  %v3578_v29 = vld [vmem:[#allocation2 + $0x514] sm:$0xf]  ;;  %v3590_v15 = vld [vmem:[#allocation2 + $0x564] sm:$0xf0]  ;;  %v3264_v16 = vor.u32 %v3597_v5, %v3261_v6 }
  0xb9   : >> { %1797 = vmatpush.bf16.msra.mxu3 %v3135_v40  ;;  %v3120_v40 = vld [vmem:[#allocation2 + $0x498] sm:$0xf0]  ;;  %v3187_v44 = vor.u32 %v3578_v29, %v3184_v30  ;;  %v3588_v29 = vld [vmem:[#allocation2 + $0x554] sm:$0xf0]  ;;  %v3618_v6 = vld [vmem:[#allocation2 + $0x644] sm:$0xf0] }
  0xba   : >> { %v3123_v53 = vor.u32 %v3562_v38, %v3120_v40  ;;  %v3593_v38 = vld [vmem:[#allocation2 + $0x584] sm:$0xf]  ;;  %v3245_v40 = vld [vmem:[#allocation2 + $0x588] sm:$0xf0] }
  0xbb   : >> { %1605 = vmatpush.bf16.msrb.mxu0 %v3022_v49  ;;  %v3176_v49 = vld [vmem:[#allocation2 + $0x508] sm:$0xf0] }
  0xbc   : >> { %1812 = vmatpush.bf16.msra.mxu1 %v3183_v45  ;;  %1821 = vmatpush.bf16.msra.mxu2 %v3155_v46  ;;  %v3243_v45 = vld [vmem:[#allocation2 + $0x580] sm:$0xf]  ;;  %v3594_v46 = vld [vmem:[#allocation2 + $0x584] sm:$0xf0]  ;;  %v3179_v59 = vor.u32 %v3576_v48, %v3176_v49 }
  0xbd   : >> { %1798 = vmatpush.bf16.msra.mxu3 %v3127_v27  ;;  %v3244_v57 = vor.u32 %v3594_v46, %v3243_v45  ;;  %v3112_v27 = vld [vmem:[#allocation2 + $0x488] sm:$0xf0]  ;;  %v3359_v46 = vor.u32 %v3622_v25, %v3358_v23  ;;  %v4066_v48 = vld.sshfl [vmem:[#allocation1 + $0x8] sm:$0xff pattern:$0x73625140] }
  0xbe   : >> { %v4086_v23 = vld [vmem:[#allocation2 + $0x630] sm:$0xf]  ;;  %v3229_v25 = vld [vmem:[#allocation2 + $0x568] sm:$0xf0] }
  0xbf   : >> { %1606 = vmatpush.bf16.msrb.mxu0 %v3014_v61  ;;  %v3115_v61 = vor.u32 %v3560_v58, %v3112_v27  ;;  %v3398_v27 = vld [vmem:[#allocation2 + $0x6b0] sm:$0xf] }
  0xc0   : >> { %1813 = vmatpush.bf16.msra.mxu1 %v3175_v1  ;;  %1822 = vmatpush.bf16.msra.mxu2 %v3147_v2  ;;  %v3301_v1 = vld [vmem:[#allocation2 + $0x5f8] sm:$0xf0]  ;;  %v3272_v2 = vor.u32 %v3599_v55, %v3269_v56 }
  0xc1   : >> { %1799 = vmatpush.bf16.msra.mxu3 %v3119_v14  ;;  %v3304_v14 = vor.u32 %v3607_v54, %v3301_v1  ;;  %v3237_v54 = vld [vmem:[#allocation2 + $0x578] sm:$0xf0] }
  0xc2   : >> { %1607 = vmatmul.bf16.vlgmr.msrb.gmra.mxu0 %v4044_v19  ;;  %v3292_v19 = vor.u32 %v3606_v34, %v3291_v32  ;;  %v3603_v32 = vld [vmem:[#allocation2 + $0x5d4] sm:$0xf]  ;;  %v3350_v34 = vld [vmem:[#allocation2 + $0x650] sm:$0xf] }
  0xc3   : >> { %1836 = vmatpush.bf16.msra.mxu0 %v3203_v10  ;;  %3204 = vmatmul.msk.bf16.vlgmr.msra.gmra.mxu1 %vm478_vm0, %v4054_v62  ;;  %v3275_v10 = vld [vmem:[#allocation2 + $0x5c0] sm:$0xf]  ;;  %v503_v30 = vpop.f32.mrf.mxu1 }
  0xc4   : >> { %2014 = vmatpush.bf16.msrb.mxu1 %v3268_v3  ;;  %1823 = vmatpush.bf16.msra.mxu2 %v3139_v18  ;;  %v3284_v3 = vor.u32 %v3604_v50, %v3283_v47  ;;  %v3293_v18 = vld [vmem:[#allocation2 + $0x5e8] sm:$0xf0]  ;;  %v3276_v20 = vor.u32 %v3602_v11, %v3275_v10  ;;  %v3601_v50 = vld [vmem:[#allocation2 + $0x5c4] sm:$0xf] }
  0xc5   : >> { %1800 = vmatpush.bf16.msra.mxu3 %v3111_v28  ;;  %v3296_v26 = vor.u32 %v3605_v17, %v3293_v18  ;;  %v3219_v28 = vld [vmem:[#allocation2 + $0x550] sm:$0xf] }
  0xc6   : >> { %v3220_v47 = vor.u32 %v3588_v29, %v3219_v28  ;;  %v490_v55 = vpop.f32.mrf.mxu0 }
  0xc7   : >> { %1837 = vmatpush.bf16.msra.mxu0 %v3195_v24  ;;  %v3228_v24 = vor.u32 %v3590_v15, %v3227_v63  ;;  %v4068_v58 = vadd.f32 %v503_v30, %v490_v55  ;;  %v3221_v55 = vld [vmem:[#allocation2 + $0x558] sm:$0xf0] }
  0xc8   : >> { %2015 = vmatpush.bf16.msrb.mxu1 %v3260_v8  ;;  %1824 = vmatpush.bf16.msra.mxu2 %v3131_v33  ;;  %v3595_v8 = vld [vmem:[#allocation2 + $0x594] sm:$0xf]  ;;  %v3285_v33 = vld [vmem:[#allocation2 + $0x5d8] sm:$0xf0] }
  0xc9   : >> { %2031 = vmatpush.bf16.msrb.mxu3 %v3300_v31  ;;  %v3256_v31 = vor.u32 %v3595_v8, %v3253_v21  ;;  %v3288_v49 = vor.u32 %v3603_v32, %v3285_v33  ;;  %v3390_v8 = vld [vmem:[#allocation2 + $0x6a0] sm:$0xf]  ;;  %v3630_v21 = vld [vmem:[#allocation2 + $0x6a4] sm:$0xf0]  ;;  %v3616_v32 = vld [vmem:[#allocation2 + $0x634] sm:$0xf0] }
  0xca   : >> { %1801 = vmatmul.bf16.vlgmr.msra.gmra.mxu3 %v4057_v41  ;;  %v4093_v33 = vld [vmem:[#allocation2 + $0x654] sm:$0xf] }
  0xcb   : >> { %1838 = vmatpush.bf16.msra.mxu0 %v3187_v44  ;;  %v3717_v44 = vld [vmem:[%s3976_s14] sm:$0x33] }
  0xcc   : >> { %2016 = vmatpush.bf16.msrb.mxu1 %v3252_v37  ;;  %1825 = vmatpush.bf16.msra.mxu2 %v3123_v53  ;;  %v3620_v37 = vld [vmem:[#allocation2 + $0x654] sm:$0xf0]  ;;  %v316_v45 = vunpack.c.l.bf16 %v3717_v44  ;;  %v3277_v53 = vld [vmem:[#allocation2 + $0x5c8] sm:$0xf0]  ;;  %v317_v56 = vunpack.c.h.bf16 %v3717_v44  ;;  %v516_v10 = vpop.f32.mrf.mxu2  ;;  %v3719_v44 = vld [vmem:[%s3976_s14 + $0x8] sm:$0x33] }
  0xcd   : >> { %2032 = vmatpush.bf16.msrb.mxu3 %v3292_v19  ;;  %v3586_v19 = vld [vmem:[#allocation2 + $0x544] sm:$0xf0]  ;;  %v3280_v11 = vor.u32 %v3601_v50, %v3277_v53  ;;  %v3587_v53 = vld [vmem:[#allocation2 + $0x554] sm:$0xf] }
  0xce   : >> { %v4071_v1 = vmax.f32 %v316_v45, %v3964_v51  ;;  %v3399_v51 = vor.u32 %v3632_v35, %v3398_v27  ;;  %v326_v15 = vmax.f32 %v317_v56, %v3966_v52  ;;  %v4089_v52 = vld.sshfl [vmem:[#allocation1] sm:$0xff pattern:$0x73625140]  ;;  %v957_v45 = vunpack.c.l.bf16 %v3719_v44 }
  0xcf   : >> { %1839 = vmatpush.bf16.msra.mxu0 %v3179_v59  ;;  %v3368_v59 = vld [vmem:[#allocation2 + $0x678] sm:$0xf0]  ;;  %v3335_v35 = vor.u32 %v3616_v32, %v4086_v23  ;;  %v1634_v23 = vunpack.c.l.bf16 %v4050_v4 }
  0xd0   : >> { %2017 = vmatpush.bf16.msrb.mxu1 %v3244_v57  ;;  %1826 = vmatpush.bf16.msra.mxu2 %v3115_v61  ;;  %v3623_v57 = vld [vmem:[#allocation2 + $0x674] sm:$0xf]  ;;  %v3342_v61 = vld [vmem:[#allocation2 + $0x640] sm:$0xf] }
  0xd1   : >> { %2033 = vmatpush.bf16.msrb.mxu3 %v3284_v3  ;;  %v3351_v3 = vor.u32 %v3620_v37, %v3350_v34  ;;  %v3371_v18 = vor.u32 %v3623_v57, %v3368_v59  ;;  %v3343_v28 = vor.u32 %v3618_v6, %v3342_v61  ;;  %v4095_v34 = vld [vmem:[#allocation2 + $0x658] sm:$0xf0]  ;;  %v492_v37 = vpop.f32.mrf.mxu0  ;;  %v1395_v57 = vunpack.c.h.bf16 %v4025_v39  ;;  %v3326_v59 = vld [vmem:[#allocation2 + $0x620] sm:$0xf] }
  0xd2   : >> { %3205 = vmatmul.msk.bf16.vlgmr.msra.gmra.mxu0 %vm478_vm0, %v4054_v62  ;;  %v3248_v62 = vor.u32 %v3593_v38, %v3245_v40  ;;  %v3391_v38 = vor.u32 %v3630_v21, %v3390_v8  ;;  %v3400_v8 = vld [vmem:[#allocation2 + $0x6b8] sm:$0xf0] }
  0xd3   : >> { %2040 = vmatpush.bf16.msrb.mxu0 %v3272_v2  ;;  %1827 = vmatmul.bf16.vlgmr.msra.gmra.mxu2 %v4057_v41  ;;  %v3211_v41 = vld [vmem:[#allocation2 + $0x540] sm:$0xf]  ;;  %v529_v2 = vpop.f32.mrf.mxu3 }
  0xd4   : >> { %2018 = vmatpush.bf16.msrb.mxu1 %v3236_v12  ;;  %2057 = vmatpush.bf16.msrb.mxu2 %v3304_v14  ;;  %v3212_v5 = vor.u32 %v3586_v19, %v3211_v41  ;;  %v4077_v12 = vld [vmem:[#allocation2 + $0x668] sm:$0xf0]  ;;  %v3718_v14 = vld [vmem:[%s3976_s14] sm:$0x77]  ;;  %v4081_v17 = vadd.f32 %v529_v2, %v516_v10  ;;  %v3382_v41 = vld [vmem:[#allocation2 + $0x690] sm:$0xf]  ;;  %v518_v61 = vpop.f32.mrf.mxu2 }
  0xd5   : >> { %2034 = vmatpush.bf16.msrb.mxu3 %v3276_v20  ;;  %v717_v36 = vunpack.c.l.bf16 %v3718_v14  ;;  %v718_v63 = vunpack.c.h.bf16 %v3718_v14  ;;  %v3240_v20 = vor.u32 %v3591_v60, %v3237_v54  ;;  %v3363_v29 = vor.u32 %v4075_v13, %v4077_v12  ;;  %v3614_v60 = vld [vmem:[#allocation2 + $0x624] sm:$0xf0]  ;;  %v3585_v10 = vld [vmem:[#allocation2 + $0x544] sm:$0xf]  ;;  %v3213_v14 = vld [vmem:[#allocation2 + $0x548] sm:$0xf0] }
  0xd6   : >> { %v3355_v54 = vor.u32 %v4093_v33, %v4095_v34  ;;  %v1399_v13 = vrot.slane %v1395_v57, 1 }
  0xd7   : >> { %2041 = vmatpush.bf16.msrb.mxu0 %v3264_v16  ;;  %v505_v16 = vpop.f32.mrf.mxu1  ;;  %v721_v30 = vrot.slane %v717_v36, 1  ;;  %v3374_v36 = vld [vmem:[#allocation2 + $0x680] sm:$0xf] }
  0xd8   : >> { %2019 = vmatpush.bf16.msrb.mxu1 %v3228_v24  ;;  %2058 = vmatpush.bf16.msrb.mxu2 %v3296_v26  ;;  %v3589_v24 = vld [vmem:[#allocation2 + $0x564] sm:$0xf] }
  0xd9   : >> { %2250 = vmatpush.bf16.msra.mxu3 %v3367_v22  ;;  %v4084_v22 = vld [vmem:[%s3976_s14 + $0x10] sm:$0x77]  ;;  %v725_v19 = vmax.f32 %v4071_v1, %v721_v30  ;;  %v4108_v1 = vld [vmem:[#allocation2 + $0x644] sm:$0xf]  ;;  %s2337_s14 = scalar_lea.sflag (%p280_p1), [#allocation4], %s254_s10 }
  0xda   : >> { %3305 = vmatmul.msk.bf16.vlgmr.msrb.gmra.mxu3 %vm478_vm0, %v4066_v48  ;;  %v2109_v26 = vunpack.c.h.b16 %v4084_v22  ;;  %v2108_v40 = vunpack.c.l.b16 %v4084_v22 }
  0xdb   : >> { %2042 = vmatpush.bf16.msrb.mxu0 %v3256_v31  ;;  %v722_v31 = vrot.slane %v718_v63, 1  ;;  %v531_v27 = vpop.f32.mrf.mxu3  ;;  %v959_v2 = vmax.f32 %v725_v19, %v957_v45  ;;  %v3626_v63 = vld [vmem:[#allocation2 + $0x684] sm:$0xf0]  ;;  %v3392_v19 = vld [vmem:[#allocation2 + $0x6a8] sm:$0xf0] }
  0xdc   : >> { %2020 = vmatpush.bf16.msrb.mxu1 %v3220_v47  ;;  %2059 = vmatpush.bf16.msrb.mxu2 %v3288_v49  ;;  %v3232_v47 = vor.u32 %v3589_v24, %v3229_v25  ;;  %v3628_v49 = vld [vmem:[#allocation2 + $0x694] sm:$0xf0]  ;;  %v4101_v56 = vpack.c.b16 %v2109_v26, %v2109_v26  ;;  %v1635_v24 = vunpack.c.h.bf16 %v4050_v4  ;;  %v3327_v25 = vor.u32 %v3614_v60, %v3326_v59  ;;  %v3615_v4 = vld [vmem:[#allocation2 + $0x634] sm:$0xf]  ;;  %v710_v27 = vpop.f32.mrf.mxu2 }
  0xdd   : >> { %2251 = vmatpush.bf16.msra.mxu3 %v3359_v46  ;;  %v958_v46 = vunpack.c.h.bf16 %v3719_v44  ;;  %v726_v50 = vmax.f32 %v326_v15, %v722_v31  ;;  %v3383_v6 = vor.u32 %v3628_v49, %v3382_v41  ;;  %v1182_v15 = vmax.f32 %v959_v2, %v3979_v42  ;;  %v3629_v49 = vld [vmem:[#allocation2 + $0x6a4] sm:$0xf]  ;;  %v3328_v2 = vld [vmem:[#allocation2 + $0x628] sm:$0xf0] }
  0xde   : >> { %v2122_v21 = vshll.u32 %v4101_v56, 16  ;;  %v3375_v30 = vor.u32 %v3626_v63, %v3374_v36  ;;  %v2072_v31 = vunpack.c.h.bf16 %v4084_v22  ;;  %v3320_v36 = vld [vmem:[#allocation2 + $0x618] sm:$0xf0] }
  0xdf   : >> { %2043 = vmatpush.bf16.msrb.mxu0 %v3248_v62  ;;  %v1394_v62 = vunpack.c.l.bf16 %v4025_v39  ;;  %v671_v12 = vpop.f32.mrf.mxu1  ;;  %v697_v61 = vpop.f32.mrf.mxu0 }
  0xe0   : >> { %2021 = vmatpush.bf16.msrb.mxu1 %v3212_v5  ;;  %2060 = vmatpush.bf16.msrb.mxu2 %v3280_v11  ;;  %v3344_v5 = vld [vmem:[#allocation2 + $0x648] sm:$0xf0]  ;;  %v4110_v11 = vpack.c.b16 %v2108_v40, %v2108_v40  ;;  %v2120_v40 = vshrl.u32 %v4101_v56, 16  ;;  %v2124_v44 = vrot.slane %v2122_v21, 1 }
  0xe1   : >> { %2252 = vmatpush.bf16.msra.mxu3 %v3351_v3  ;;  %v960_v3 = vmax.f32 %v726_v50, %v958_v46  ;;  %v1398_v39 = vrot.slane %v1394_v62, 1  ;;  %v3347_v26 = vor.u32 %v4108_v1, %v3344_v5  ;;  %v2076_v46 = vrot.slane %v2072_v31, 1  ;;  %v3610_v62 = vld [vmem:[#allocation2 + $0x604] sm:$0xf0]  ;;  %v3613_v1 = vld [vmem:[#allocation2 + $0x624] sm:$0xf] }
  0xe2   : >> { %v2115_v32 = vshll.u32 %v4110_v11, 16  ;;  %v2113_v60 = vshrl.u32 %v4110_v11, 16  ;;  %v3627_v5 = vld [vmem:[#allocation2 + $0x694] sm:$0xf]  ;;  %v3312_v21 = vld [vmem:[#allocation2 + $0x608] sm:$0xf0] }
  0xe3   : >> { %2044 = vmatpush.bf16.msrb.mxu0 %v3240_v20  ;;  %2022 = vmatmul.bf16.vlgmr.msrb.gmra.mxu1 %v4089_v52  ;;  %v1183_v16 = vmax.f32 %v960_v3, %v3981_v43  ;;  %v3631_v20 = vld [vmem:[#allocation2 + $0x6b4] sm:$0xf]  ;;  %v1402_v42 = vmax.f32 %v1182_v15, %v1398_v39  ;;  %v3318_v43 = vld [vmem:[#allocation2 + $0x610] sm:$0xf]  ;;  %v3395_v3 = vor.u32 %v3629_v49, %v3392_v19 }
  0xe4   : >> { %2267 = vmatpush.bf16.msra.mxu1 %v3399_v51  ;;  %2276 = vmatpush.bf16.msra.mxu2 %v3371_v18  ;;  %v3224_v51 = vor.u32 %v3587_v53, %v3221_v55  ;;  %v672_v18 = vadd.f32 %v671_v12, %v4068_v58  ;;  %v3216_v58 = vor.u32 %v3585_v10, %v3213_v14  ;;  %v3310_v55 = vld [vmem:[#allocation2 + $0x600] sm:$0xf]  ;;  %v3611_v14 = vld [vmem:[#allocation2 + $0x614] sm:$0xf] }
  0xe5   : >> { %2253 = vmatpush.bf16.msra.mxu3 %v3343_v28  ;;  %3306 = vmatmul.msk.bf16.vlgmr.msrb.gmra.mxu2 %vm478_vm0, %v4066_v48  ;;  %v1403_v28 = vmax.f32 %v1183_v16, %v1399_v13  ;;  %v2071_v48 = vunpack.c.l.bf16 %v4084_v22  ;;  %v3403_v33 = vor.u32 %v3631_v20, %v3400_v8  ;;  %v1636_v34 = vmax.f32 %v1402_v42, %v1634_v23  ;;  %v3625_v16 = vld [vmem:[#allocation2 + $0x684] sm:$0xf]  ;;  %v712_v20 = vpop.f32.mrf.mxu2 }
  0xe6   : >> { %v698_v39 = vadd.f32 %v697_v61, %v4081_v17  ;;  %v3331_v13 = vor.u32 %v3613_v1, %v3328_v2  ;;  %v3609_v8 = vld [vmem:[#allocation2 + $0x604] sm:$0xf] }
  0xe7   : >> { %2045 = vmatpush.bf16.msrb.mxu0 %v3232_v47  ;;  %v1637_v37 = vmax.f32 %v1403_v28, %v1635_v24  ;;  %v2075_v45 = vrot.slane %v2071_v48, 1  ;;  %v684_v47 = vpop.f32.mrf.mxu3  ;;  %v1859_v22 = vmax.f32 %v1636_v34, %v4019_v7  ;;  %v673_v57 = vpop.f32.mrf.mxu1  ;;  %v2125_v7 = vor.u32 %v2124_v44, %v2120_v40 }
  0xe8   : >> { %2268 = vmatpush.bf16.msra.mxu1 %v3391_v38  ;;  %2277 = vmatpush.bf16.msra.mxu2 %v3363_v29  ;;  %v3612_v29 = vld [vmem:[#allocation2 + $0x614] sm:$0xf0]  ;;  %v3336_v38 = vld [vmem:[#allocation2 + $0x638] sm:$0xf0]  ;;  %v685_v53 = vadd.f32 %v684_v47, %v672_v18  ;;  %v3376_v18 = vld [vmem:[#allocation2 + $0x688] sm:$0xf0]  ;;  %v699_v24 = vpop.f32.mrf.mxu0 }
  0xe9   : >> { %2254 = vmatpush.bf16.msra.mxu3 %v3335_v35  ;;  %v3319_v41 = vor.u32 %v3612_v29, %v3318_v43  ;;  %v1860_v50 = vmax.f32 %v1637_v37, %v4021_v9  ;;  %v3339_v56 = vor.u32 %v3615_v4, %v3336_v38  ;;  %v2079_v35 = vmax.f32 %v1859_v22, %v2075_v45 }
  0xea   : >> { %v3311_v9 = vor.u32 %v3610_v62, %v3310_v55  ;;  %v3379_v23 = vor.u32 %v3625_v16, %v3376_v18 }
  0xeb   : >> { %2046 = vmatpush.bf16.msrb.mxu0 %v3224_v51  ;;  %v2080_v59 = vmax.f32 %v1860_v50, %v2076_v46  ;;  %v711_v51 = vadd.f32 %v710_v27, %v698_v39 }
  0xec   : >> { %2269 = vmatpush.bf16.msra.mxu1 %v3383_v6  ;;  %2278 = vmatpush.bf16.msra.mxu2 %v3355_v54  ;;  %v2117_v54 = vrot.slane %v2115_v32, 1  ;;  %v3384_v6 = vld [vmem:[#allocation2 + $0x698] sm:$0xf0] }
  0xed   : >> { %2255 = vmatpush.bf16.msra.mxu3 %v3327_v25  ;;  %v2081_v10 = vpack.c.bf16 %v2080_v59, %v2079_v35  ;;  %v3387_v63 = vor.u32 %v3627_v5, %v3384_v6 }
  0xee   : >> { %v2118_v11 = vor.u32 %v2117_v54, %v2113_v60 }
  0xef   : >> { %2047 = vmatpush.bf16.msrb.mxu0 %v3216_v58  ;;  %v2313_v12 = vunpack.c.l.bf16 %v2081_v10  ;;  %v686_v15 = vpop.f32.mrf.mxu3  ;;  %v918_v17 = vpop.f32.mrf.mxu1  ;;  %v2314_v25 = vunpack.c.h.bf16 %v2081_v10 }
  0xf0   : >> { %2270 = vmatpush.bf16.msra.mxu1 %v3375_v30  ;;  %2279 = vmatpush.bf16.msra.mxu2 %v3347_v26  ;;  %v3315_v26 = vor.u32 %v3609_v8, %v3312_v21  ;;  %v944_v58 = vpop.f32.mrf.mxu0 }
  0xf1   : >> { %2256 = vmatpush.bf16.msra.mxu3 %v3319_v41  ;;  %2317 = vrot.lane.b32.xlu0 %v2313_v12, %s3845_s21 }
  0xf2   : >> { %2048 = vmatmul.bf16.vlgmr.msrb.gmra.mxu0 %v4089_v52  ;;  %v3323_v52 = vor.u32 %v3611_v14, %v3320_v36 }
  0xf3   : >> { %2293 = vmatpush.bf16.msra.mxu0 %v3403_v33  ;;  %3404 = vmatmul.msk.bf16.vlgmr.msra.gmra.mxu1 %vm478_vm0, %v2125_v7 }
  0xf4   : >> { %2280 = vmatpush.bf16.msra.mxu2 %v3339_v56 }
  0xf5   : >> { %2257 = vmatpush.bf16.msra.mxu3 %v3311_v9 }
  0xf6   : >> { %v931_v48 = vpop.f32.mrf.mxu2 }
  0xf7   : >> { %2294 = vmatpush.bf16.msra.mxu0 %v3395_v3  ;;  %v905_v42 = vpop.f32.mrf.mxu3  ;;  %v920_v43 = vpop.f32.mrf.mxu1  ;;  %v945_v31 = vadd.f32 %v944_v58, %v931_v48 }
  0xf8   : >> { %2281 = vmatpush.bf16.msra.mxu2 %v3331_v13  ;;  %2258 = vmatmul.bf16.vlgmr.msra.gmra.mxu3 %v2118_v11  ;;  %v919_v28 = vadd.f32 %v918_v17, %v905_v42  ;;  %v946_v4 = vpop.f32.mrf.mxu0 }
  0xf9   : >> { %2319 = vrot.lane.b32.xlu0 %v2314_v25, %s3845_s21  ;;  %v949_v32 = vadd.f32 %v945_v31, %v711_v51  ;;  %s3764_s21 = sshra.s32 (%p280_p1), %s2355_s13, 4  ;;  %s3765_s21 = int_to_ptr.hbm [resolvable:$true] %s3764_s21 }
  0xfa   : >> { %v948_v29 = vadd.f32 %v919_v28, %v685_v53  ;;  %s3766_s8 = scalar_lea.hbm (%p280_p1), %s3765_s21, 48  ;;  %p3771_p6 = scmp.lt.s32.totalorder (%p280_p1), %s3765_s21, %s4190_s4 }
  0xfb   : >> { %2295 = vmatpush.bf16.msra.mxu0 %v3387_v63  ;;  %p3767_p2 = scmp.ne.s32.totalorder (%p280_p1), %s3765_s21, %s3766_s8  ;;  %p3772_p7 = scmp.lt.s32.totalorder (%p280_p1), %s3770_s11, %s3766_s8 }
  0xfc   : >> { %2282 = vmatpush.bf16.msra.mxu2 %v3323_v52 }
  0xfd   : > { %p3768_p3 = pnand (%p280_p1), %p3767_p2, %p3913_p4  ;;  %p3773_p9 = por (%p280_p1), %p3772_p7, %p3771_p6 }
  0xfe   : >> { %v933_v37 = vpop.f32.mrf.mxu2 }
  0xff   : >> { %2296 = vmatpush.bf16.msra.mxu0 %v3379_v23  ;;  %v907_v30 = vpop.f32.mrf.mxu3  ;;  %p3769_p5 = pneg (%p280_p1), %p3768_p3 }
 0x100   : >> { %2283 = vmatpush.bf16.msra.mxu2 %v3315_v26  ;;  %v1125_v33 = vpop.f32.mrf.mxu1 }
 0x101   : > { %p3774_p10 = pnand (%p280_p1), %p3773_p9, %p3769_p5 }
 0x102   : >> { %3405 = vmatmul.msk.bf16.vlgmr.msra.gmra.mxu0 %vm478_vm0, %v2125_v7 }
 0x103   : >> { %2284 = vmatmul.bf16.vlgmr.msra.gmra.mxu2 %v2118_v11 }
 0x107   : >> { %v1138_v34 = vpop.f32.mrf.mxu3 }
 0x108   : >> { %v1139_v38 = vadd.f32 %v1138_v34, %v1125_v33  ;;  %v1127_v44 = vpop.f32.mrf.mxu1  ;;  %v1164_v46 = vpop.f32.mrf.mxu2 }
 0x10a   : >> { %v1168_v40 = vadd.f32 %v1139_v38, %v948_v29 }
 0x10f   : >> { %v1140_v45 = vpop.f32.mrf.mxu3  ;;  %v1151_v47 = vpop.f32.mrf.mxu0 }
 0x110   : >> { %v1165_v41 = vadd.f32 %v1164_v46, %v1151_v47  ;;  %v1359_v49 = vpop.f32.mrf.mxu1  ;;  %v1166_v19 = vpop.f32.mrf.mxu2 }
 0x111   : >> { %v2305_v19 = vperm.slane %v3946_v0, 0 }
 0x112   : >> { %v1169_v22 = vadd.f32 %v1165_v41, %v949_v32  ;;  %v2306_v41 = vperm.slane %v3946_v0, 1 }
 0x117   : >> { %v1153_v50 = vpop.f32.mrf.mxu0 }
 0x118   : >> { %v1361_v53 = vpop.f32.mrf.mxu1 }
 0x11d   : >> { %v1346_v55 = vpop.f32.mrf.mxu3 }
 0x11e   : >> { %v1360_v62 = vadd.f32 %v1359_v49, %v1346_v55 }
 0x11f   : >> { %v1385_v56 = vpop.f32.mrf.mxu0 }
 0x120   : >> { %v1389_v57 = vadd.f32 %v1360_v62, %v1168_v40 }
 0x125   : >> { %v1348_v27 = vpop.f32.mrf.mxu3 }
 0x126   : >> { %v1372_v35 = vpop.f32.mrf.mxu2 }
 0x127   : >> { %v1386_v59 = vadd.f32 %v1385_v56, %v1372_v35  ;;  %v1387_v54 = vpop.f32.mrf.mxu0 }
 0x129   : >> { %v1390_v60 = vadd.f32 %v1386_v59, %v1169_v22 }
 0x12d   : >> { %v1595_v2 = vpop.f32.mrf.mxu3 }
 0x12e   : >> { %v1374_v7 = vpop.f32.mrf.mxu2 }
 0x130   : >> { %v1582_v1 = vpop.f32.mrf.mxu1 }
 0x131   : >> { %v1596_v3 = vadd.f32 %v1595_v2, %v1582_v1 }
 0x133   : >> { %v1625_v9 = vadd.f32 %v1596_v3, %v1389_v57 }
 0x135   : >> { %v1597_v5 = vpop.f32.mrf.mxu3 }
 0x138   : >> { %v1584_v61 = vpop.f32.mrf.mxu1  ;;  %v1621_v6 = vpop.f32.mrf.mxu2 }
 0x13f   : >> { %v1608_v10 = vpop.f32.mrf.mxu0 }
 0x140   : >> { %v1815_v39 = vpop.f32.mrf.mxu1  ;;  %v1623_v13 = vpop.f32.mrf.mxu2  ;;  %v1622_v58 = vadd.f32 %v1621_v6, %v1608_v10 }
 0x142   : >> { %v1626_v4 = vadd.f32 %v1622_v58, %v1390_v60 }
 0x147   : >> { %v1610_v12 = vpop.f32.mrf.mxu0 }
 0x148   : >> { %v1817_v11 = vpop.f32.mrf.mxu1 }
 0x14d   : >> { %v1802_v51 = vpop.f32.mrf.mxu3 }
 0x14e   : >> { %v1816_v30 = vadd.f32 %v1815_v39, %v1802_v51 }
 0x14f   : >> { %v1841_v14 = vpop.f32.mrf.mxu0 }
 0x150   : >> { %v1845_v34 = vadd.f32 %v1816_v30, %v1625_v9 }
 0x155   : >> { %v1804_v36 = vpop.f32.mrf.mxu3 }
 0x156   : >> { %v1828_v63 = vpop.f32.mrf.mxu2 }
 0x157   : >> { %v1843_v15 = vpop.f32.mrf.mxu0  ;;  %v1842_v31 = vadd.f32 %v1841_v14, %v1828_v63 }
 0x159   : >> { %v1846_v40 = vadd.f32 %v1842_v31, %v1626_v4 }
 0x15d   : >> { %v2036_v18 = vpop.f32.mrf.mxu3 }
 0x15e   : >> { %v1830_v17 = vpop.f32.mrf.mxu2 }
 0x160   : >> { %v2023_v16 = vpop.f32.mrf.mxu1 }
 0x161   : >> { %v2037_v32 = vadd.f32 %v2036_v18, %v2023_v16 }
 0x163   : >> { %v2318_v52 = vpop.permute.xlu0 %2317  ;;  %v2066_v44 = vadd.f32 %v2037_v32, %v1845_v34 }
 0x165   : >> { %v2038_v8 = vpop.f32.mrf.mxu3 }
 0x168   : >> { %v2025_v20 = vpop.f32.mrf.mxu1  ;;  %v2062_v21 = vpop.f32.mrf.mxu2 }
 0x16b   : >> { %v2320_v24 = vpop.permute.xlu0 %2319 }
 0x16c   : >> { %v2321_v25 = vsel %vm478_vm0, %v2318_v52, %v2320_v24 }
 0x16d   : >> { %2335 = vst [vmem:[%s4135_s26 + $0x8] sm:$0xf] %v2321_v25 }
 0x16f   : >> { %v2049_v23 = vpop.f32.mrf.mxu0 }
 0x170   : >> { %v2272_v26 = vpop.f32.mrf.mxu1  ;;  %v2064_v42 = vpop.f32.mrf.mxu2  ;;  %v2063_v33 = vadd.f32 %v2062_v21, %v2049_v23 }
 0x172   : >> { %v2067_v46 = vadd.f32 %v2063_v33, %v1846_v40 }
 0x177   : >> { %v2051_v28 = vpop.f32.mrf.mxu0 }
 0x178   : >> { %v2274_v43 = vpop.f32.mrf.mxu1 }
 0x17b   : >> { %v2259_v29 = vpop.f32.mrf.mxu3 }
 0x17c   : >> { %v2273_v37 = vadd.f32 %v2272_v26, %v2259_v29 }
 0x17e   : >> { %v2302_v49 = vadd.f32 %v2273_v37, %v2066_v44 }
 0x17f   : >> { %v2298_v48 = vpop.f32.mrf.mxu0 }
 0x180   : >> { %v2309_v55 = vadd.f32 %v2305_v19, %v2302_v49 }
 0x182   : >> { %v2311_v27 = vmax.f32 %v2309_v55, 0.0 }
 0x183   : >> { %v2261_v38 = vpop.f32.mrf.mxu3 }
 0x186   : >> { %v2285_v45 = vpop.f32.mrf.mxu2 }
 0x187   : >> { %v2299_v47 = vadd.f32 %v2298_v48, %v2285_v45  ;;  %v2300_v22 = vpop.f32.mrf.mxu0 }
 0x189   : >> { %v2303_v50 = vadd.f32 %v2299_v47, %v2067_v46 }
 0x18b   : >> { %v2310_v53 = vadd.f32 %v2306_v41, %v2303_v50 }
 0x18d   : >> { %v2312_v62 = vmax.f32 %v2310_v53, 0.0 }
 0x18e   : >> { %v2287_v57 = vpop.f32.mrf.mxu2 }
 0x18f   : >> { %v2324_v56 = vsel %vm478_vm0, %v2312_v62, %v2318_v52  ;;  %282 = sbr.rel (!%p280_p1) target bundleno = 32 (0x20), region = 101 }
 0x190   : >> { %v2327_v35 = vrot.slane %v2324_v56, 4 }
 0x192   : >> { %v2329_v59 = vsel %vm2328_vm1, %v2311_v27, %v2327_v35 }
 0x193   : >> { %2334 = vst [vmem:[%s4135_s26] sm:$0xff] %v2329_v59 }
 0x194   : > { %3777 = shalt.err (!%p3774_p10)
}
 0x195   : > { %s3846_s10 = smov 192   ;;  %s3847_s22 = smov 12  }
 0x196   : > { %3642 = dma.vmem_to_hbm [thread:$0]  (%p3913_p4), %s2353_s30, 768, %s2355_s13, %s2337_s14, %s3846_s10, %s3846_s10, %s3847_s22  }
 0x197 PF: > { %p3654_p11 = scmp.ge.s32.totalorder %s3836_s20, 2  ;;  %s2369_s26 = sand.u32 1, %s3816_s15  }
 0x198   : > { %s2370_s29 = scalar_lea.sflag [#allocation4], %s2369_s26 }
 0x199   : > { %p3649_p12 = pnand %p3654_p11, %p3920_p8 }
 0x19b   : > { %p3650_p13 = pneg %p3649_p12 }
 0x19d   : > { %3811 = dma.done.wait (%p3650_p13), %s2370_s29, 768  }
 0x19e   : > { %3813 = vsyncadd (%p3650_p13), %s2370_s29, 4294966528  ;;  %s18_s20 = sadd.s32 1, %s3836_s20   ;;  %s4193_s15 = smov %s3820_s16 }
 0x19f   : > { %p15_p0 = scmp.ge.s32.totalorder %s18_s20, 4   ;;  %s4194_s16 = smov %s3824_s17 }
 0x1a0   : > { %s4195_s17 = smov %s3926_s28  ;;  %s4196_s18 = smov %s3832_s19 }
 0x1a1   : > { %s4197_s19 = smov %s4199_s23  ;;  %17 = sbr.rel (!%p15_p0) target bundleno = 5 (0x5), region = 112 }
 0x1a6   :  { %2376 = vsyncpa [#allocation3], 1 }
 0x1a7   :  { %2378 = vsyncpa [#allocation3 + $0x1], 1 }
 0x1a8   :  { %2379 = vsyncpa [#allocation4], 1 }
 0x1a9   :  { %2381 = vsyncpa [#allocation4 + $0x1], 1 }

</bundles_post_ra>
